<compile_context>
chip_gen: v7x
topology: tpu7x:2x2x1
jax: 0.10.0
libtpu: 0.0.40
codegen_flags: <defaults>
</compile_context>

<pallas_src>
import jax
import jax.numpy as jnp
from jax.experimental import pallas as pl
from jax.experimental.pallas import tpu as pltpu


def _round_up(x, m):
    return ((x + m - 1) // m) * m


# (dy, dx, laplacian coeff, sobel-x coeff, sobel-y coeff)
# shift(x, dy, dx)[i, j] == x[i - dy, j - dx]
_STENCIL = (
    (1, 1, 2.0, -1.0, -1.0),
    (1, -1, 2.0, 1.0, -1.0),
    (-1, 1, 2.0, -1.0, 1.0),
    (-1, -1, 2.0, 1.0, 1.0),
    (0, 1, 0.0, -2.0, 0.0),
    (0, -1, 0.0, 2.0, 0.0),
    (1, 0, 0.0, 0.0, -2.0),
    (-1, 0, 0.0, 0.0, 2.0),
)


def _make_loss_kernel(H, W, Hp, Wp):
    """Fused per-image kernel: L1 partial sum + edge/texture masked sums."""

    def shift(x, dy, dx):
        # out[i, j] = x[i - dy, j - dx]; cyclic, but pad rows/cols are zero and
        # Hp > H, Wp > W, so +-1 shifts never wrap live data into the valid region.
        y = x
        if dy % Hp:
            y = pltpu.roll(y, shift=dy % Hp, axis=0)
        if dx % Wp:
            y = pltpu.roll(y, shift=dx % Wp, axis=1)
        return y

    def dilate3x3(x):
        # Separable 3x3 max: vertical then horizontal (4 rolls instead of 8).
        v = jnp.maximum(x, jnp.maximum(shift(x, 1, 0), shift(x, -1, 0)))
        return jnp.maximum(v, jnp.maximum(shift(v, 0, 1), shift(v, 0, -1)))

    def kernel(orig_ref, pred_ref, out_ref, gpad_ref):
        # ---- grayscale of the quantized original (channel 0 treated as "B",
        # as the reference's cv2.COLOR_BGR2GRAY does on the permuted tensor).
        b = jnp.floor(orig_ref[0, 0] * 255.0)
        g = jnp.floor(orig_ref[0, 1] * 255.0)
        r = jnp.floor(orig_ref[0, 2] * 255.0)
        # TODO(synk): cv2 uses fixed-point BGR2GRAY coefficients; float approx here.
        gray = jnp.floor(0.114 * b + 0.587 * g + 0.299 * r + 0.5)      # (H, W)

        # Zero-padded gray plane in VMEM scratch (guaranteed zero border).
        gpad_ref[...] = jnp.zeros_like(gpad_ref)
        gpad_ref[0:H, 0:W] = gray
        gp = gpad_ref[...]                                             # (Hp, Wp)

        # ---- Laplacian (cv2 ksize=3 kernel [[2,0,2],[0,-8,0],[2,0,2]]) and
        # Sobel gradients, accumulating one shifted plane at a time.
        lap = -8.0 * gp
        gx = jnp.zeros_like(gp)
        gy = jnp.zeros_like(gp)
        for dy, dx, cl, cx, cy in _STENCIL:
            s = shift(gp, dy, dx)
            if cl:
                lap = lap + cl * s
            if cx:
                gx = gx + cx * s
            if cy:
                gy = gy + cy * s

        rows = jax.lax.broadcasted_iota(jnp.int32, (Hp, Wp), 0)
        cols = jax.lax.broadcasted_iota(jnp.int32, (Hp, Wp), 1)
        valid = (rows < H) & (cols < W)

        # TODO(synk): cv2 uses BORDER_REFLECT_101 at image borders; zero border here.
        lap_abs = jnp.where(valid, jnp.minimum(jnp.abs(lap), 255.0), 0.0)
        # TODO(synk): cv2.Canny non-max suppression + hysteresis (90/100) have no
        # clean Pallas equivalent; a Sobel |grad| threshold at the high threshold.
        mag = jnp.abs(gx) + jnp.abs(gy)
        canny = jnp.where(valid & (mag > 100.0), 1.0, 0.0)

        # TODO(synk): cv2.dilate(img, (3, 3)) with a tuple kernel actually builds a
        # 1x2 structuring element; the intended 3x3 dilation is used here.
        edge_bin = dilate3x3(canny)[0:H, 0:W] > 0.0                    # (H, W) bool
        tex_mask = dilate3x3(lap_abs)[0:H, 0:W].astype(jnp.int32)      # (H, W) 0..255

        edge_ground = jnp.sum(edge_bin.astype(jnp.float32)) * 3.0
        tex_ground = jnp.sum((tex_mask > 0).astype(jnp.float32)) * 3.0

        # ---- per-channel sums: L1 on the float data, masked wrap-around |diff|
        # on the quantized data (torch uint8 subtraction wraps mod 256, and
        # torch.abs is a no-op on uint8).
        l1_sum = jnp.float32(0.0)
        edge_sum = jnp.float32(0.0)
        tex_sum = jnp.float32(0.0)
        for c in range(3):
            o_f = orig_ref[0, c]
            p_f = pred_ref[0, c]
            l1_sum = l1_sum + jnp.sum(jnp.abs(o_f - p_f))
            o_u = (o_f * 255.0).astype(jnp.int32)
            p_u = (p_f * 255.0).astype(jnp.int32)
            # Edge mask is binary (0/255 after Canny+dilate), so AND-then-subtract
            # reduces exactly to selecting the wrapped diff where the mask is set.
            d = jnp.bitwise_and(o_u - p_u, 255)
            edge_sum = edge_sum + jnp.sum(jnp.where(edge_bin, d, 0)).astype(jnp.float32)
            # NOTE: the reference really ANDs pixel values with the *non-binary*
            # dilated |Laplacian| (cv2.bitwise_and(img, lap3)); we keep that exact
            # semantics rather than binarizing the texture mask.
            td = jnp.bitwise_and(
                jnp.bitwise_and(o_u, tex_mask) - jnp.bitwise_and(p_u, tex_mask), 255)
            tex_sum = tex_sum + jnp.sum(td).astype(jnp.float32)

        # Lane-dense per-image results tile: lanes 0..4 hold the five scalars.
        lane = jax.lax.broadcasted_iota(jnp.int32, (8, 128), 1)
        tile = ((lane == 0) * l1_sum + (lane == 1) * edge_sum
                + (lane == 2) * edge_ground + (lane == 3) * tex_sum
                + (lane == 4) * tex_ground)
        out_ref[0] = tile.astype(jnp.float32)

    return kernel


def _loss_forward(pred, orig):
    """Mirrors Loss.forward.  Returns (total, l1, edge, texture) as jnp scalars
    (call float(...) on the last three to match the reference's Python floats;
    kept as jnp here so the whole forward stays jittable)."""
    assert pred.shape == orig.shape
    N, C, H, W = orig.shape
    assert C == 3

    Hp = _round_up(H + 1, 8)      # strictly > H -> guaranteed zero pad row
    Wp = _round_up(W + 1, 128)    # strictly > W -> guaranteed zero pad col

    # Explicit VMEM budget: 2 inputs x 2 pipeline buffers + output tiles +
    # gray scratch + headroom for the ~5 live f32 plane temporaries.
    plane_bytes = Hp * Wp * 4
    block_in_bytes = 3 * H * W * 4
    vmem_est = 4 * block_in_bytes + 2 * 8 * 128 * 4 + 9 * plane_bytes + (1 << 20)
    vmem_limit = int(min(max(vmem_est, 32 * 1024 * 1024), 120 * 1024 * 1024))

    kernel = _make_loss_kernel(H, W, Hp, Wp)
    res = pl.pallas_call(
        kernel,
        out_shape=jax.ShapeDtypeStruct((N, 8, 128), jnp.float32),
        grid=(N,),
        in_specs=[pl.BlockSpec((1, 3, H, W), lambda i: (i, 0, 0, 0)),
                  pl.BlockSpec((1, 3, H, W), lambda i: (i, 0, 0, 0))],
        out_specs=pl.BlockSpec((1, 8, 128), lambda i: (i, 0, 0)),
        scratch_shapes=[pltpu.VMEM((Hp, Wp), jnp.float32)],
        compiler_params=pltpu.CompilerParams(
            dimension_semantics=("parallel",),
            vmem_limit_bytes=vmem_limit),
    )(orig.astype(jnp.float32), pred.astype(jnp.float32))

    l1_sums = res[:, 0, 0]
    e_s, e_g = res[:, 0, 1], res[:, 0, 2]
    t_s, t_g = res[:, 0, 3], res[:, 0, 4]

    l1_loss = jnp.sum(l1_sums) / (H * W * 3) / N
    # guard against an all-zero mask (the torch reference would divide by zero here)
    edge_loss = jnp.sum(jnp.where(e_g > 0, e_s / (e_g * 255.0), 0.0)) / N
    texture_loss = jnp.sum(jnp.where(t_g > 0, t_s / (t_g * 255.0), 0.0)) / N
    total = l1_loss + edge_loss + texture_loss
    return total, l1_loss, edge_loss, texture_loss


loss_forward = jax.jit(_loss_forward)


if __name__ == "__main__":
    key = jax.random.PRNGKey(0)
    k1, k2 = jax.random.split(key)
    pred = jax.random.uniform(k1, (2, 3, 16, 16), dtype=jnp.float32)
    orig = jax.random.uniform(k2, (2, 3, 16, 16), dtype=jnp.float32)

    total, l1, edge, tex = loss_forward(pred, orig)
    jax.block_until_ready(total)
    print("KERNEL_OK")
</pallas_src>

<mosaic_0001>
module attributes {stable_mosaic.version = 11 : i64} {
  func.func @kernel(%arg0: i32, %arg1: memref<1x3x16x16xf32, #tpu.memory_space<vmem>>, %arg2: memref<1x3x16x16xf32, #tpu.memory_space<vmem>>, %arg3: memref<1x8x128xf32, #tpu.memory_space<vmem>>, %arg4: memref<24x128xf32, #tpu.memory_space<vmem>>) attributes {dimension_semantics = [#tpu.dimension_semantics<parallel>], iteration_bounds = array<i64: 2>, scalar_prefetch = 0 : i64, scratch_operands = 1 : i64, tpu.core_type = #tpu.core_type<tc>, window_params = [{transform_indices = @transform_0, window_bounds = array<i64: 1, 3, 16, 16>}, {transform_indices = @transform_1, window_bounds = array<i64: 1, 3, 16, 16>}, {transform_indices = @transform_2, window_bounds = array<i64: 1, 8, 128>}]} {
    %c0 = arith.constant 0 : index
    %c0_0 = arith.constant 0 : index
    %c0_1 = arith.constant 0 : index
    %c0_2 = arith.constant 0 : index
    %0 = vector.load %arg1[%c0, %c0_0, %c0_1, %c0_2] : memref<1x3x16x16xf32, #tpu.memory_space<vmem>>, vector<1x1x16x16xf32>
    %1 = vector.shape_cast %0 : vector<1x1x16x16xf32> to vector<16x16xf32>
    %cst = arith.constant 2.550000e+02 : f32
    %2 = vector.broadcast %cst : f32 to vector<16x16xf32>
    %3 = arith.mulf %1, %2 : vector<16x16xf32>
    %4 = math.floor %3 : vector<16x16xf32>
    %c0_3 = arith.constant 0 : index
    %c1 = arith.constant 1 : index
    %c0_4 = arith.constant 0 : index
    %c0_5 = arith.constant 0 : index
    %5 = vector.load %arg1[%c0_3, %c1, %c0_4, %c0_5] : memref<1x3x16x16xf32, #tpu.memory_space<vmem>>, vector<1x1x16x16xf32>
    %6 = vector.shape_cast %5 : vector<1x1x16x16xf32> to vector<16x16xf32>
    %cst_6 = arith.constant 2.550000e+02 : f32
    %7 = vector.broadcast %cst_6 : f32 to vector<16x16xf32>
    %8 = arith.mulf %6, %7 : vector<16x16xf32>
    %9 = math.floor %8 : vector<16x16xf32>
    %c0_7 = arith.constant 0 : index
    %c2 = arith.constant 2 : index
    %c0_8 = arith.constant 0 : index
    %c0_9 = arith.constant 0 : index
    %10 = vector.load %arg1[%c0_7, %c2, %c0_8, %c0_9] : memref<1x3x16x16xf32, #tpu.memory_space<vmem>>, vector<1x1x16x16xf32>
    %11 = vector.shape_cast %10 : vector<1x1x16x16xf32> to vector<16x16xf32>
    %cst_10 = arith.constant 2.550000e+02 : f32
    %12 = vector.broadcast %cst_10 : f32 to vector<16x16xf32>
    %13 = arith.mulf %11, %12 : vector<16x16xf32>
    %14 = math.floor %13 : vector<16x16xf32>
    %cst_11 = arith.constant 1.140000e-01 : f32
    %15 = vector.broadcast %cst_11 : f32 to vector<16x16xf32>
    %16 = arith.mulf %15, %4 : vector<16x16xf32>
    %cst_12 = arith.constant 5.870000e-01 : f32
    %17 = vector.broadcast %cst_12 : f32 to vector<16x16xf32>
    %18 = arith.mulf %17, %9 : vector<16x16xf32>
    %19 = arith.addf %16, %18 : vector<16x16xf32>
    %cst_13 = arith.constant 2.990000e-01 : f32
    %20 = vector.broadcast %cst_13 : f32 to vector<16x16xf32>
    %21 = arith.mulf %20, %14 : vector<16x16xf32>
    %22 = arith.addf %19, %21 : vector<16x16xf32>
    %cst_14 = arith.constant 5.000000e-01 : f32
    %23 = vector.broadcast %cst_14 : f32 to vector<16x16xf32>
    %24 = arith.addf %22, %23 : vector<16x16xf32>
    %25 = math.floor %24 : vector<16x16xf32>
    %cst_15 = arith.constant 0.000000e+00 : f32
    %26 = vector.broadcast %cst_15 : f32 to vector<24x128xf32>
    %c0_16 = arith.constant 0 : index
    %c0_17 = arith.constant 0 : index
    %27 = vector.load %arg4[%c0_16, %c0_17] : memref<24x128xf32, #tpu.memory_space<vmem>>, vector<24x128xf32>
    tpu.vector_store %arg4[%c0_16, %c0_17], %26 {strides = array<i32>} : memref<24x128xf32, #tpu.memory_space<vmem>>, vector<24x128xf32>,
    %c0_18 = arith.constant 0 : index
    %c0_19 = arith.constant 0 : index
    %28 = vector.load %arg4[%c0_18, %c0_19] : memref<24x128xf32, #tpu.memory_space<vmem>>, vector<16x16xf32>
    tpu.vector_store %arg4[%c0_18, %c0_19], %25 {strides = array<i32>} : memref<24x128xf32, #tpu.memory_space<vmem>>, vector<16x16xf32>,
    %c0_20 = arith.constant 0 : index
    %c0_21 = arith.constant 0 : index
    %29 = vector.load %arg4[%c0_20, %c0_21] : memref<24x128xf32, #tpu.memory_space<vmem>>, vector<24x128xf32>
    %cst_22 = arith.constant -8.000000e+00 : f32
    %30 = vector.broadcast %cst_22 : f32 to vector<24x128xf32>
    %31 = arith.mulf %30, %29 : vector<24x128xf32>
    %cst_23 = arith.constant 0.000000e+00 : f32
    %32 = vector.broadcast %cst_23 : f32 to vector<24x128xf32>
    %cst_24 = arith.constant 0.000000e+00 : f32
    %33 = vector.broadcast %cst_24 : f32 to vector<24x128xf32>
    %c1_i32 = arith.constant 1 : i32
    %34 = tpu.dynamic_rotate %29 by %c1_i32 dim 0 : vector<24x128xf32>, i32 -> vector<24x128xf32>
    %c1_i32_25 = arith.constant 1 : i32
    %35 = tpu.dynamic_rotate %34 by %c1_i32_25 dim 1 : vector<24x128xf32>, i32 -> vector<24x128xf32>
    %cst_26 = arith.constant 2.000000e+00 : f32
    %36 = vector.broadcast %cst_26 : f32 to vector<24x128xf32>
    %37 = arith.mulf %36, %35 : vector<24x128xf32>
    %38 = arith.addf %31, %37 : vector<24x128xf32>
    %cst_27 = arith.constant -1.000000e+00 : f32
    %39 = vector.broadcast %cst_27 : f32 to vector<24x128xf32>
    %40 = arith.mulf %39, %35 : vector<24x128xf32>
    %41 = arith.addf %32, %40 : vector<24x128xf32>
    %cst_28 = arith.constant -1.000000e+00 : f32
    %42 = vector.broadcast %cst_28 : f32 to vector<24x128xf32>
    %43 = arith.mulf %42, %35 : vector<24x128xf32>
    %44 = arith.addf %33, %43 : vector<24x128xf32>
    %c1_i32_29 = arith.constant 1 : i32
    %45 = tpu.dynamic_rotate %29 by %c1_i32_29 dim 0 : vector<24x128xf32>, i32 -> vector<24x128xf32>
    %c127_i32 = arith.constant 127 : i32
    %46 = tpu.dynamic_rotate %45 by %c127_i32 dim 1 : vector<24x128xf32>, i32 -> vector<24x128xf32>
    %cst_30 = arith.constant 2.000000e+00 : f32
    %47 = vector.broadcast %cst_30 : f32 to vector<24x128xf32>
    %48 = arith.mulf %47, %46 : vector<24x128xf32>
    %49 = arith.addf %38, %48 : vector<24x128xf32>
    %cst_31 = arith.constant 1.000000e+00 : f32
    %50 = vector.broadcast %cst_31 : f32 to vector<24x128xf32>
    %51 = arith.mulf %50, %46 : vector<24x128xf32>
    %52 = arith.addf %41, %51 : vector<24x128xf32>
    %cst_32 = arith.constant -1.000000e+00 : f32
    %53 = vector.broadcast %cst_32 : f32 to vector<24x128xf32>
    %54 = arith.mulf %53, %46 : vector<24x128xf32>
    %55 = arith.addf %44, %54 : vector<24x128xf32>
    %c23_i32 = arith.constant 23 : i32
    %56 = tpu.dynamic_rotate %29 by %c23_i32 dim 0 : vector<24x128xf32>, i32 -> vector<24x128xf32>
    %c1_i32_33 = arith.constant 1 : i32
    %57 = tpu.dynamic_rotate %56 by %c1_i32_33 dim 1 : vector<24x128xf32>, i32 -> vector<24x128xf32>
    %cst_34 = arith.constant 2.000000e+00 : f32
    %58 = vector.broadcast %cst_34 : f32 to vector<24x128xf32>
    %59 = arith.mulf %58, %57 : vector<24x128xf32>
    %60 = arith.addf %49, %59 : vector<24x128xf32>
    %cst_35 = arith.constant -1.000000e+00 : f32
    %61 = vector.broadcast %cst_35 : f32 to vector<24x128xf32>
    %62 = arith.mulf %61, %57 : vector<24x128xf32>
    %63 = arith.addf %52, %62 : vector<24x128xf32>
    %cst_36 = arith.constant 1.000000e+00 : f32
    %64 = vector.broadcast %cst_36 : f32 to vector<24x128xf32>
    %65 = arith.mulf %64, %57 : vector<24x128xf32>
    %66 = arith.addf %55, %65 : vector<24x128xf32>
    %c23_i32_37 = arith.constant 23 : i32
    %67 = tpu.dynamic_rotate %29 by %c23_i32_37 dim 0 : vector<24x128xf32>, i32 -> vector<24x128xf32>
    %c127_i32_38 = arith.constant 127 : i32
    %68 = tpu.dynamic_rotate %67 by %c127_i32_38 dim 1 : vector<24x128xf32>, i32 -> vector<24x128xf32>
    %cst_39 = arith.constant 2.000000e+00 : f32
    %69 = vector.broadcast %cst_39 : f32 to vector<24x128xf32>
    %70 = arith.mulf %69, %68 : vector<24x128xf32>
    %71 = arith.addf %60, %70 : vector<24x128xf32>
    %cst_40 = arith.constant 1.000000e+00 : f32
    %72 = vector.broadcast %cst_40 : f32 to vector<24x128xf32>
    %73 = arith.mulf %72, %68 : vector<24x128xf32>
    %74 = arith.addf %63, %73 : vector<24x128xf32>
    %cst_41 = arith.constant 1.000000e+00 : f32
    %75 = vector.broadcast %cst_41 : f32 to vector<24x128xf32>
    %76 = arith.mulf %75, %68 : vector<24x128xf32>
    %77 = arith.addf %66, %76 : vector<24x128xf32>
    %c1_i32_42 = arith.constant 1 : i32
    %78 = tpu.dynamic_rotate %29 by %c1_i32_42 dim 1 : vector<24x128xf32>, i32 -> vector<24x128xf32>
    %cst_43 = arith.constant -2.000000e+00 : f32
    %79 = vector.broadcast %cst_43 : f32 to vector<24x128xf32>
    %80 = arith.mulf %79, %78 : vector<24x128xf32>
    %81 = arith.addf %74, %80 : vector<24x128xf32>
    %c127_i32_44 = arith.constant 127 : i32
    %82 = tpu.dynamic_rotate %29 by %c127_i32_44 dim 1 : vector<24x128xf32>, i32 -> vector<24x128xf32>
    %cst_45 = arith.constant 2.000000e+00 : f32
    %83 = vector.broadcast %cst_45 : f32 to vector<24x128xf32>
    %84 = arith.mulf %83, %82 : vector<24x128xf32>
    %85 = arith.addf %81, %84 : vector<24x128xf32>
    %c1_i32_46 = arith.constant 1 : i32
    %86 = tpu.dynamic_rotate %29 by %c1_i32_46 dim 0 : vector<24x128xf32>, i32 -> vector<24x128xf32>
    %cst_47 = arith.constant -2.000000e+00 : f32
    %87 = vector.broadcast %cst_47 : f32 to vector<24x128xf32>
    %88 = arith.mulf %87, %86 : vector<24x128xf32>
    %89 = arith.addf %77, %88 : vector<24x128xf32>
    %c23_i32_48 = arith.constant 23 : i32
    %90 = tpu.dynamic_rotate %29 by %c23_i32_48 dim 0 : vector<24x128xf32>, i32 -> vector<24x128xf32>
    %cst_49 = arith.constant 2.000000e+00 : f32
    %91 = vector.broadcast %cst_49 : f32 to vector<24x128xf32>
    %92 = arith.mulf %91, %90 : vector<24x128xf32>
    %93 = arith.addf %89, %92 : vector<24x128xf32>
    %94 = tpu.iota {dimensions = array<i32: 0>} : vector<24x128xi32>
    %95 = tpu.iota {dimensions = array<i32: 1>} : vector<24x128xi32>
    %c16_i32 = arith.constant 16 : i32
    %96 = vector.broadcast %c16_i32 : i32 to vector<24x128xi32>
    %97 = arith.cmpi slt, %94, %96 : vector<24x128xi32>
    %c16_i32_50 = arith.constant 16 : i32
    %98 = vector.broadcast %c16_i32_50 : i32 to vector<24x128xi32>
    %99 = arith.cmpi slt, %95, %98 : vector<24x128xi32>
    %100 = arith.andi %97, %99 : vector<24x128xi1>
    %101 = math.absf %71 : vector<24x128xf32>
    %cst_51 = arith.constant 2.550000e+02 : f32
    %102 = vector.broadcast %cst_51 : f32 to vector<24x128xf32>
    %103 = arith.minimumf %101, %102 : vector<24x128xf32>
    %cst_52 = arith.constant 0.000000e+00 : f32
    %104 = vector.broadcast %cst_52 : f32 to vector<24x128xf32>
    %105 = arith.select %100, %103, %104 : vector<24x128xi1>, vector<24x128xf32>
    %106 = math.absf %85 : vector<24x128xf32>
    %107 = math.absf %93 : vector<24x128xf32>
    %108 = arith.addf %106, %107 : vector<24x128xf32>
    %cst_53 = arith.constant 1.000000e+02 : f32
    %109 = vector.broadcast %cst_53 : f32 to vector<24x128xf32>
    %110 = arith.cmpf ogt, %108, %109 : vector<24x128xf32>
    %111 = arith.andi %100, %110 : vector<24x128xi1>
    %cst_54 = arith.constant 1.000000e+00 : f32
    %cst_55 = arith.constant 0.000000e+00 : f32
    %112 = vector.broadcast %cst_54 : f32 to vector<24x128xf32>
    %113 = vector.broadcast %cst_55 : f32 to vector<24x128xf32>
    %114 = arith.select %111, %112, %113 : vector<24x128xi1>, vector<24x128xf32>
    %c1_i32_56 = arith.constant 1 : i32
    %115 = tpu.dynamic_rotate %114 by %c1_i32_56 dim 0 : vector<24x128xf32>, i32 -> vector<24x128xf32>
    %c23_i32_57 = arith.constant 23 : i32
    %116 = tpu.dynamic_rotate %114 by %c23_i32_57 dim 0 : vector<24x128xf32>, i32 -> vector<24x128xf32>
    %117 = arith.maximumf %115, %116 : vector<24x128xf32>
    %118 = arith.maximumf %114, %117 : vector<24x128xf32>
    %c1_i32_58 = arith.constant 1 : i32
    %119 = tpu.dynamic_rotate %118 by %c1_i32_58 dim 1 : vector<24x128xf32>, i32 -> vector<24x128xf32>
    %c127_i32_59 = arith.constant 127 : i32
    %120 = tpu.dynamic_rotate %118 by %c127_i32_59 dim 1 : vector<24x128xf32>, i32 -> vector<24x128xf32>
    %121 = arith.maximumf %119, %120 : vector<24x128xf32>
    %122 = arith.maximumf %118, %121 : vector<24x128xf32>
    %123 = vector.extract_strided_slice %122 {offsets = [0, 0], sizes = [16, 16], strides = [1, 1]} : vector<24x128xf32> to vector<16x16xf32>
    %cst_60 = arith.constant 0.000000e+00 : f32
    %124 = vector.broadcast %cst_60 : f32 to vector<16x16xf32>
    %125 = arith.cmpf ogt, %123, %124 : vector<16x16xf32>
    %c1_i32_61 = arith.constant 1 : i32
    %126 = tpu.dynamic_rotate %105 by %c1_i32_61 dim 0 : vector<24x128xf32>, i32 -> vector<24x128xf32>
    %c23_i32_62 = arith.constant 23 : i32
    %127 = tpu.dynamic_rotate %105 by %c23_i32_62 dim 0 : vector<24x128xf32>, i32 -> vector<24x128xf32>
    %128 = arith.maximumf %126, %127 : vector<24x128xf32>
    %129 = arith.maximumf %105, %128 : vector<24x128xf32>
    %c1_i32_63 = arith.constant 1 : i32
    %130 = tpu.dynamic_rotate %129 by %c1_i32_63 dim 1 : vector<24x128xf32>, i32 -> vector<24x128xf32>
    %c127_i32_64 = arith.constant 127 : i32
    %131 = tpu.dynamic_rotate %129 by %c127_i32_64 dim 1 : vector<24x128xf32>, i32 -> vector<24x128xf32>
    %132 = arith.maximumf %130, %131 : vector<24x128xf32>
    %133 = arith.maximumf %129, %132 : vector<24x128xf32>
    %134 = vector.extract_strided_slice %133 {offsets = [0, 0], sizes = [16, 16], strides = [1, 1]} : vector<24x128xf32> to vector<16x16xf32>
    %135 = arith.fptosi %134 : vector<16x16xf32> to vector<16x16xi32>
    %136 = arith.extui %125 : vector<16x16xi1> to vector<16x16xi32>
    %137 = arith.sitofp %136 : vector<16x16xi32> to vector<16x16xf32>
    %138 = vector.shape_cast %137 : vector<16x16xf32> to vector<1x16x16xf32>
    %cst_65 = arith.constant dense<0.000000e+00> : vector<1xf32>
    %139 = vector.multi_reduction <add>, %138, %cst_65 [1, 2] : vector<1x16x16xf32> to vector<1xf32>
    %140 = vector.shape_cast %139 : vector<1xf32> to vector<1x1x1xf32>
    %141 = vector.extract %140[0, 0, 0] : f32 from vector<1x1x1xf32>
    %cst_66 = arith.constant 3.000000e+00 : f32
    %142 = arith.mulf %141, %cst_66 : f32
    %c0_i32 = arith.constant 0 : i32
    %143 = vector.broadcast %c0_i32 : i32 to vector<16x16xi32>
    %144 = arith.cmpi sgt, %135, %143 : vector<16x16xi32>
    %145 = arith.extui %144 : vector<16x16xi1> to vector<16x16xi32>
    %146 = arith.sitofp %145 : vector<16x16xi32> to vector<16x16xf32>
    %147 = vector.shape_cast %146 : vector<16x16xf32> to vector<1x16x16xf32>
    %cst_67 = arith.constant dense<0.000000e+00> : vector<1xf32>
    %148 = vector.multi_reduction <add>, %147, %cst_67 [1, 2] : vector<1x16x16xf32> to vector<1xf32>
    %149 = vector.shape_cast %148 : vector<1xf32> to vector<1x1x1xf32>
    %150 = vector.extract %149[0, 0, 0] : f32 from vector<1x1x1xf32>
    %cst_68 = arith.constant 3.000000e+00 : f32
    %151 = arith.mulf %150, %cst_68 : f32
    %c0_69 = arith.constant 0 : index
    %c0_70 = arith.constant 0 : index
    %c0_71 = arith.constant 0 : index
    %c0_72 = arith.constant 0 : index
    %152 = vector.load %arg1[%c0_69, %c0_70, %c0_71, %c0_72] : memref<1x3x16x16xf32, #tpu.memory_space<vmem>>, vector<1x1x16x16xf32>
    %153 = vector.shape_cast %152 : vector<1x1x16x16xf32> to vector<16x16xf32>
    %c0_73 = arith.constant 0 : index
    %c0_74 = arith.constant 0 : index
    %c0_75 = arith.constant 0 : index
    %c0_76 = arith.constant 0 : index
    %154 = vector.load %arg2[%c0_73, %c0_74, %c0_75, %c0_76] : memref<1x3x16x16xf32, #tpu.memory_space<vmem>>, vector<1x1x16x16xf32>
    %155 = vector.shape_cast %154 : vector<1x1x16x16xf32> to vector<16x16xf32>
    %156 = arith.subf %153, %155 : vector<16x16xf32>
    %157 = math.absf %156 : vector<16x16xf32>
    %158 = vector.shape_cast %157 : vector<16x16xf32> to vector<1x16x16xf32>
    %cst_77 = arith.constant dense<0.000000e+00> : vector<1xf32>
    %159 = vector.multi_reduction <add>, %158, %cst_77 [1, 2] : vector<1x16x16xf32> to vector<1xf32>
    %160 = vector.shape_cast %159 : vector<1xf32> to vector<1x1x1xf32>
    %161 = vector.extract %160[0, 0, 0] : f32 from vector<1x1x1xf32>
    %cst_78 = arith.constant 0.000000e+00 : f32
    %162 = arith.addf %cst_78, %161 : f32
    %cst_79 = arith.constant 2.550000e+02 : f32
    %163 = vector.broadcast %cst_79 : f32 to vector<16x16xf32>
    %164 = arith.mulf %153, %163 : vector<16x16xf32>
    %165 = arith.fptosi %164 : vector<16x16xf32> to vector<16x16xi32>
    %cst_80 = arith.constant 2.550000e+02 : f32
    %166 = vector.broadcast %cst_80 : f32 to vector<16x16xf32>
    %167 = arith.mulf %155, %166 : vector<16x16xf32>
    %168 = arith.fptosi %167 : vector<16x16xf32> to vector<16x16xi32>
    %169 = arith.subi %165, %168 : vector<16x16xi32>
    %c255_i32 = arith.constant 255 : i32
    %170 = vector.broadcast %c255_i32 : i32 to vector<16x16xi32>
    %171 = arith.andi %169, %170 : vector<16x16xi32>
    %c0_i32_81 = arith.constant 0 : i32
    %172 = vector.broadcast %c0_i32_81 : i32 to vector<16x16xi32>
    %173 = arith.select %125, %171, %172 : vector<16x16xi1>, vector<16x16xi32>
    %174 = vector.shape_cast %173 : vector<16x16xi32> to vector<1x16x16xi32>
    %cst_82 = arith.constant dense<0> : vector<1xi32>
    %175 = vector.multi_reduction <add>, %174, %cst_82 [1, 2] : vector<1x16x16xi32> to vector<1xi32>
    %176 = vector.shape_cast %175 : vector<1xi32> to vector<1x1x1xi32>
    %177 = vector.extract %176[0, 0, 0] : i32 from vector<1x1x1xi32>
    %178 = arith.sitofp %177 : i32 to f32
    %cst_83 = arith.constant 0.000000e+00 : f32
    %179 = arith.addf %cst_83, %178 : f32
    %180 = arith.andi %165, %135 : vector<16x16xi32>
    %181 = arith.andi %168, %135 : vector<16x16xi32>
    %182 = arith.subi %180, %181 : vector<16x16xi32>
    %c255_i32_84 = arith.constant 255 : i32
    %183 = vector.broadcast %c255_i32_84 : i32 to vector<16x16xi32>
    %184 = arith.andi %182, %183 : vector<16x16xi32>
    %185 = vector.shape_cast %184 : vector<16x16xi32> to vector<1x16x16xi32>
    %cst_85 = arith.constant dense<0> : vector<1xi32>
    %186 = vector.multi_reduction <add>, %185, %cst_85 [1, 2] : vector<1x16x16xi32> to vector<1xi32>
    %187 = vector.shape_cast %186 : vector<1xi32> to vector<1x1x1xi32>
    %188 = vector.extract %187[0, 0, 0] : i32 from vector<1x1x1xi32>
    %189 = arith.sitofp %188 : i32 to f32
    %cst_86 = arith.constant 0.000000e+00 : f32
    %190 = arith.addf %cst_86, %189 : f32
    %c0_87 = arith.constant 0 : index
    %c1_88 = arith.constant 1 : index
    %c0_89 = arith.constant 0 : index
    %c0_90 = arith.constant 0 : index
    %191 = vector.load %arg1[%c0_87, %c1_88, %c0_89, %c0_90] : memref<1x3x16x16xf32, #tpu.memory_space<vmem>>, vector<1x1x16x16xf32>
    %192 = vector.shape_cast %191 : vector<1x1x16x16xf32> to vector<16x16xf32>
    %c0_91 = arith.constant 0 : index
    %c1_92 = arith.constant 1 : index
    %c0_93 = arith.constant 0 : index
    %c0_94 = arith.constant 0 : index
    %193 = vector.load %arg2[%c0_91, %c1_92, %c0_93, %c0_94] : memref<1x3x16x16xf32, #tpu.memory_space<vmem>>, vector<1x1x16x16xf32>
    %194 = vector.shape_cast %193 : vector<1x1x16x16xf32> to vector<16x16xf32>
    %195 = arith.subf %192, %194 : vector<16x16xf32>
    %196 = math.absf %195 : vector<16x16xf32>
    %197 = vector.shape_cast %196 : vector<16x16xf32> to vector<1x16x16xf32>
    %cst_95 = arith.constant dense<0.000000e+00> : vector<1xf32>
    %198 = vector.multi_reduction <add>, %197, %cst_95 [1, 2] : vector<1x16x16xf32> to vector<1xf32>
    %199 = vector.shape_cast %198 : vector<1xf32> to vector<1x1x1xf32>
    %200 = vector.extract %199[0, 0, 0] : f32 from vector<1x1x1xf32>
    %201 = arith.addf %162, %200 : f32
    %cst_96 = arith.constant 2.550000e+02 : f32
    %202 = vector.broadcast %cst_96 : f32 to vector<16x16xf32>
    %203 = arith.mulf %192, %202 : vector<16x16xf32>
    %204 = arith.fptosi %203 : vector<16x16xf32> to vector<16x16xi32>
    %cst_97 = arith.constant 2.550000e+02 : f32
    %205 = vector.broadcast %cst_97 : f32 to vector<16x16xf32>
    %206 = arith.mulf %194, %205 : vector<16x16xf32>
    %207 = arith.fptosi %206 : vector<16x16xf32> to vector<16x16xi32>
    %208 = arith.subi %204, %207 : vector<16x16xi32>
    %c255_i32_98 = arith.constant 255 : i32
    %209 = vector.broadcast %c255_i32_98 : i32 to vector<16x16xi32>
    %210 = arith.andi %208, %209 : vector<16x16xi32>
    %c0_i32_99 = arith.constant 0 : i32
    %211 = vector.broadcast %c0_i32_99 : i32 to vector<16x16xi32>
    %212 = arith.select %125, %210, %211 : vector<16x16xi1>, vector<16x16xi32>
    %213 = vector.shape_cast %212 : vector<16x16xi32> to vector<1x16x16xi32>
    %cst_100 = arith.constant dense<0> : vector<1xi32>
    %214 = vector.multi_reduction <add>, %213, %cst_100 [1, 2] : vector<1x16x16xi32> to vector<1xi32>
    %215 = vector.shape_cast %214 : vector<1xi32> to vector<1x1x1xi32>
    %216 = vector.extract %215[0, 0, 0] : i32 from vector<1x1x1xi32>
    %217 = arith.sitofp %216 : i32 to f32
    %218 = arith.addf %179, %217 : f32
    %219 = arith.andi %204, %135 : vector<16x16xi32>
    %220 = arith.andi %207, %135 : vector<16x16xi32>
    %221 = arith.subi %219, %220 : vector<16x16xi32>
    %c255_i32_101 = arith.constant 255 : i32
    %222 = vector.broadcast %c255_i32_101 : i32 to vector<16x16xi32>
    %223 = arith.andi %221, %222 : vector<16x16xi32>
    %224 = vector.shape_cast %223 : vector<16x16xi32> to vector<1x16x16xi32>
    %cst_102 = arith.constant dense<0> : vector<1xi32>
    %225 = vector.multi_reduction <add>, %224, %cst_102 [1, 2] : vector<1x16x16xi32> to vector<1xi32>
    %226 = vector.shape_cast %225 : vector<1xi32> to vector<1x1x1xi32>
    %227 = vector.extract %226[0, 0, 0] : i32 from vector<1x1x1xi32>
    %228 = arith.sitofp %227 : i32 to f32
    %229 = arith.addf %190, %228 : f32
    %c0_103 = arith.constant 0 : index
    %c2_104 = arith.constant 2 : index
    %c0_105 = arith.constant 0 : index
    %c0_106 = arith.constant 0 : index
    %230 = vector.load %arg1[%c0_103, %c2_104, %c0_105, %c0_106] : memref<1x3x16x16xf32, #tpu.memory_space<vmem>>, vector<1x1x16x16xf32>
    %231 = vector.shape_cast %230 : vector<1x1x16x16xf32> to vector<16x16xf32>
    %c0_107 = arith.constant 0 : index
    %c2_108 = arith.constant 2 : index
    %c0_109 = arith.constant 0 : index
    %c0_110 = arith.constant 0 : index
    %232 = vector.load %arg2[%c0_107, %c2_108, %c0_109, %c0_110] : memref<1x3x16x16xf32, #tpu.memory_space<vmem>>, vector<1x1x16x16xf32>
    %233 = vector.shape_cast %232 : vector<1x1x16x16xf32> to vector<16x16xf32>
    %234 = arith.subf %231, %233 : vector<16x16xf32>
    %235 = math.absf %234 : vector<16x16xf32>
    %236 = vector.shape_cast %235 : vector<16x16xf32> to vector<1x16x16xf32>
    %cst_111 = arith.constant dense<0.000000e+00> : vector<1xf32>
    %237 = vector.multi_reduction <add>, %236, %cst_111 [1, 2] : vector<1x16x16xf32> to vector<1xf32>
    %238 = vector.shape_cast %237 : vector<1xf32> to vector<1x1x1xf32>
    %239 = vector.extract %238[0, 0, 0] : f32 from vector<1x1x1xf32>
    %240 = arith.addf %201, %239 : f32
    %cst_112 = arith.constant 2.550000e+02 : f32
    %241 = vector.broadcast %cst_112 : f32 to vector<16x16xf32>
    %242 = arith.mulf %231, %241 : vector<16x16xf32>
    %243 = arith.fptosi %242 : vector<16x16xf32> to vector<16x16xi32>
    %cst_113 = arith.constant 2.550000e+02 : f32
    %244 = vector.broadcast %cst_113 : f32 to vector<16x16xf32>
    %245 = arith.mulf %233, %244 : vector<16x16xf32>
    %246 = arith.fptosi %245 : vector<16x16xf32> to vector<16x16xi32>
    %247 = arith.subi %243, %246 : vector<16x16xi32>
    %c255_i32_114 = arith.constant 255 : i32
    %248 = vector.broadcast %c255_i32_114 : i32 to vector<16x16xi32>
    %249 = arith.andi %247, %248 : vector<16x16xi32>
    %c0_i32_115 = arith.constant 0 : i32
    %250 = vector.broadcast %c0_i32_115 : i32 to vector<16x16xi32>
    %251 = arith.select %125, %249, %250 : vector<16x16xi1>, vector<16x16xi32>
    %252 = vector.shape_cast %251 : vector<16x16xi32> to vector<1x16x16xi32>
    %cst_116 = arith.constant dense<0> : vector<1xi32>
    %253 = vector.multi_reduction <add>, %252, %cst_116 [1, 2] : vector<1x16x16xi32> to vector<1xi32>
    %254 = vector.shape_cast %253 : vector<1xi32> to vector<1x1x1xi32>
    %255 = vector.extract %254[0, 0, 0] : i32 from vector<1x1x1xi32>
    %256 = arith.sitofp %255 : i32 to f32
    %257 = arith.addf %218, %256 : f32
    %258 = arith.andi %243, %135 : vector<16x16xi32>
    %259 = arith.andi %246, %135 : vector<16x16xi32>
    %260 = arith.subi %258, %259 : vector<16x16xi32>
    %c255_i32_117 = arith.constant 255 : i32
    %261 = vector.broadcast %c255_i32_117 : i32 to vector<16x16xi32>
    %262 = arith.andi %260, %261 : vector<16x16xi32>
    %263 = vector.shape_cast %262 : vector<16x16xi32> to vector<1x16x16xi32>
    %cst_118 = arith.constant dense<0> : vector<1xi32>
    %264 = vector.multi_reduction <add>, %263, %cst_118 [1, 2] : vector<1x16x16xi32> to vector<1xi32>
    %265 = vector.shape_cast %264 : vector<1xi32> to vector<1x1x1xi32>
    %266 = vector.extract %265[0, 0, 0] : i32 from vector<1x1x1xi32>
    %267 = arith.sitofp %266 : i32 to f32
    %268 = arith.addf %229, %267 : f32
    %269 = tpu.iota {dimensions = array<i32: 1>} : vector<8x128xi32>
    %c0_i32_119 = arith.constant 0 : i32
    %270 = vector.broadcast %c0_i32_119 : i32 to vector<8x128xi32>
    %271 = arith.cmpi eq, %269, %270 : vector<8x128xi32>
    %272 = arith.extui %271 : vector<8x128xi1> to vector<8x128xi32>
    %273 = arith.sitofp %272 : vector<8x128xi32> to vector<8x128xf32>
    %274 = vector.broadcast %240 : f32 to vector<8x128xf32>
    %275 = arith.mulf %273, %274 : vector<8x128xf32>
    %c1_i32_120 = arith.constant 1 : i32
    %276 = vector.broadcast %c1_i32_120 : i32 to vector<8x128xi32>
    %277 = arith.cmpi eq, %269, %276 : vector<8x128xi32>
    %278 = arith.extui %277 : vector<8x128xi1> to vector<8x128xi32>
    %279 = arith.sitofp %278 : vector<8x128xi32> to vector<8x128xf32>
    %280 = vector.broadcast %257 : f32 to vector<8x128xf32>
    %281 = arith.mulf %279, %280 : vector<8x128xf32>
    %282 = arith.addf %275, %281 : vector<8x128xf32>
    %c2_i32 = arith.constant 2 : i32
    %283 = vector.broadcast %c2_i32 : i32 to vector<8x128xi32>
    %284 = arith.cmpi eq, %269, %283 : vector<8x128xi32>
    %285 = arith.extui %284 : vector<8x128xi1> to vector<8x128xi32>
    %286 = arith.sitofp %285 : vector<8x128xi32> to vector<8x128xf32>
    %287 = vector.broadcast %142 : f32 to vector<8x128xf32>
    %288 = arith.mulf %286, %287 : vector<8x128xf32>
    %289 = arith.addf %282, %288 : vector<8x128xf32>
    %c3_i32 = arith.constant 3 : i32
    %290 = vector.broadcast %c3_i32 : i32 to vector<8x128xi32>
    %291 = arith.cmpi eq, %269, %290 : vector<8x128xi32>
    %292 = arith.extui %291 : vector<8x128xi1> to vector<8x128xi32>
    %293 = arith.sitofp %292 : vector<8x128xi32> to vector<8x128xf32>
    %294 = vector.broadcast %268 : f32 to vector<8x128xf32>
    %295 = arith.mulf %293, %294 : vector<8x128xf32>
    %296 = arith.addf %289, %295 : vector<8x128xf32>
    %c4_i32 = arith.constant 4 : i32
    %297 = vector.broadcast %c4_i32 : i32 to vector<8x128xi32>
    %298 = arith.cmpi eq, %269, %297 : vector<8x128xi32>
    %299 = arith.extui %298 : vector<8x128xi1> to vector<8x128xi32>
    %300 = arith.sitofp %299 : vector<8x128xi32> to vector<8x128xf32>
    %301 = vector.broadcast %151 : f32 to vector<8x128xf32>
    %302 = arith.mulf %300, %301 : vector<8x128xf32>
    %303 = arith.addf %296, %302 : vector<8x128xf32>
    %c0_121 = arith.constant 0 : index
    %c0_122 = arith.constant 0 : index
    %c0_123 = arith.constant 0 : index
    %304 = vector.load %arg3[%c0_121, %c0_122, %c0_123] : memref<1x8x128xf32, #tpu.memory_space<vmem>>, vector<1x8x128xf32>
    %305 = vector.shape_cast %304 : vector<1x8x128xf32> to vector<8x128xf32>
    %306 = vector.shape_cast %303 : vector<8x128xf32> to vector<1x8x128xf32>
    tpu.vector_store %arg3[%c0_121, %c0_122, %c0_123], %306 {strides = array<i32>} : memref<1x8x128xf32, #tpu.memory_space<vmem>>, vector<1x8x128xf32>,
    return
  }
  func.func @transform_0(%arg0: i32) -> (i32, i32, i32, i32) {
    %c0_i32 = arith.constant 0 : i32
    %c0_i32_0 = arith.constant 0 : i32
    %c0_i32_1 = arith.constant 0 : i32
    %c0_i32_2 = arith.constant 0 : i32
    return %arg0, %c0_i32, %c0_i32_0, %c0_i32_1 : i32, i32, i32, i32
  }
  func.func @transform_1(%arg0: i32) -> (i32, i32, i32, i32) {
    %c0_i32 = arith.constant 0 : i32
    %c0_i32_0 = arith.constant 0 : i32
    %c0_i32_1 = arith.constant 0 : i32
    %c0_i32_2 = arith.constant 0 : i32
    return %arg0, %c0_i32, %c0_i32_0, %c0_i32_1 : i32, i32, i32, i32
  }
  func.func @transform_2(%arg0: i32) -> (i32, i32, i32) {
    %c0_i32 = arith.constant 0 : i32
    %c0_i32_0 = arith.constant 0 : i32
    %c0_i32_1 = arith.constant 0 : i32
    return %arg0, %c0_i32, %c0_i32_0 : i32, i32, i32
  }
}

</mosaic_0001>

<bundles_post_ra>
// kernel: _loss_forward.1
= control target key start
LH: loop header
LB: loop body
LE: loop exit
PB: predicated region body
PF: predicated region fallthrough
CT: control target
= control target key end

     0   :  { %7 = vsyncpa [#allocation4], 0  ;;  %s1610_s0 = inlined_call_operand.hbm [shape: f32[2,3,16,16], index: 0, kind: input, shape index: {}]   ;;  %s1611_s1 = inlined_call_operand.hbm [shape: f32[2,3,16,16], index: 1, kind: input, shape index: {}]   ;;  %s1612_s2 = inlined_call_operand.vmem [shape: f32[2,8,128], index: 2, kind: output, shape index: {}]  }
   0x1   :  { %9 = vsyncpa [#allocation4 + $0x1], 0 }
   0x2   :  { %10 = vsyncpa [#allocation6], 0 }
   0x3   :  { %12 = vsyncpa [#allocation6 + $0x1], 0  ;;  %s1168_s9 = smov 0   ;;  %s1170_s10 = smov 0  }
   0x4   :  { %s1172_s11 = smov 0   ;;  %s1174_s12 = smov 0  }
   0x5 LB: > { %s1187_s13 = sadd.s32 4294967295, %s1144_s12   ;;  %s1190_s14 = sadd.s32 1, %s1144_s12   ;;  %s1144_s12 = sphi %s1174_s12, %s1626_s12   ;;  %s1140_s11 = sphi %s1172_s11, %s1625_s11   ;;  %s1136_s10 = sphi %s1170_s10, %s1624_s10   ;;  %s1132_s9 = sphi %s1168_s9, %s1623_s9  }
   0x6   : > { %s22_s15 = ssub.s32 %s1144_s12, %s1190_s14  ;;  %s25_s16 = sadd.s32 1, %s1140_s11 }
   0x7   : > { %p23_p0 = scmp.eq.s32.totalorder %s22_s15, 0  ;;  %p32_p1 = scmp.ne.s32.totalorder %s1140_s11, %s1136_s10 }
   0x8   : > { %p33_p2 = scmp.eq.s32.totalorder %s1144_s12, 0  ;;  %p38_p3 = scmp.ne.s32.totalorder %s1136_s10, %s1132_s9 }
   0x9   : > { %s1200_s17 = scalar_select %p23_p0, %s1140_s11, %s25_s16  }
   0xa   : > { %p34_p4 = por %p33_p2, %p32_p1  ;;  %p39_p5 = scmp.eq.s32.totalorder %s1187_s13, 0 }
   0xb   : > { %p997_p6 = scmp.lt.s32.totalorder %s1144_s12, 2  ;;  %s1209_s19 = sand.u32 1, %s1140_s11  }
   0xc   : > { %p1204_p7 = por %p39_p5, %p38_p3  ;;  %s931_s20 = smul.u32 48, %s1209_s19 }
   0xd   : > { %s932_s21 = smul.u32 768, %s1144_s12  ;;  %p1213_p8 = pnand %p997_p6, %p34_p4 }
   0xe   : > { %s1614_s18 = scalar_select %p1204_p7, 1, 0 }
   0xf   : > { %s1222_s25 = scalar_lea.hbm %s1610_s0, %s932_s21  ;;  %s118_s26 = scalar_lea.vmem [#allocation3], %s931_s20 }
  0x10   : > { %s125_s27 = sshll.u32 %s118_s26, 4  ;;  %s115_s28 = scalar_lea.sflag [#allocation4], %s1209_s19  ;;  %s1226_s27 = int_to_ptr.vmem [resolvable:$true] %s125_s27 }
  0x11   : > { %s1046_s29 = scalar_lea.hbm %s1222_s25, 768  ;;  %p1048_p11 = pneg %p1213_p8 }
  0x12   : > { %p1047_p10 = scmp.ne.s32.totalorder %s1222_s25, %s1046_s29  ;;  %s1051_s4 = scalar_lea.hbm %s1610_s0, 1536 }
  0x13   : > { %p1052_p0 = scmp.lt.u32.totalorder %s1222_s25, %s1610_s0  ;;  %p1053_p1 = scmp.lt.u32.totalorder %s1051_s4, %s1046_s29 }
  0x14   : > { %p1049_p12 = pnand %p1048_p11, %p1047_p10  ;;  %p1055_p3 = scmp.lt.u32.totalorder %s1046_s29, %s1222_s25 }
  0x15   : > { %p1054_p2 = por %p1053_p1, %p1052_p0 }
  0x16   : > { %p1050_p13 = pneg %p1049_p12 }
  0x17   : > { %p1056_p4 = por %p1055_p3, %p1054_p2 }
  0x19   : > { %p1057_p5 = pnand %p1056_p4, %p1050_p13 }
  0x1b   : > { %1060 = shalt.err (!%p1057_p5)
}
  0x1c   : > { %s1061_s7 = scalar_lea.vmem %s1226_s27, 768  ;;  %s1146_s8 = smov [#allocation3]  }
  0x1d   : > { %p1062_p6 = scmp.ne.s32.totalorder %s1226_s27, %s1061_s7  ;;  %s1066_s9 = sshll.u32 %s1146_s8, 4  ;;  %s1067_s9 = int_to_ptr.vmem [resolvable:$false] %s1066_s9 }
  0x1e   : > { %s1068_s15 = scalar_lea.vmem %s1067_s9, 1536  ;;  %p1069_p9 = scmp.lt.s32.totalorder %s1226_s27, %s1067_s9 }
  0x1f   : > { %p1064_p10 = pnand %p1062_p6, %p1048_p11  ;;  %p1070_p0 = scmp.lt.s32.totalorder %s1068_s15, %s1061_s7 }
  0x21   : > { %p1065_p12 = pneg %p1064_p10  ;;  %p1071_p1 = por %p1070_p0, %p1069_p9 }
  0x23   : > { %p1072_p2 = pnand %p1071_p1, %p1065_p12 }
  0x25   : > { %1075 = shalt.err (!%p1072_p2)
}
  0x26   : > { %s1147_s16 = smov 128   ;;  %s1148_s23 = smov 8  }
  0x27   : > { %993 = dma.hbm_to_vmem [thread:$0]  (!%p1213_p8), %s1222_s25, 768, %s1226_s27, %s115_s28, %s1147_s16, %s1147_s16, %s1148_s23  }
  0x28   : > { %p154_p9 = scmp.lt.s32.totalorder %s1144_s12, 3  ;;  %s1266_s29 = scalar_lea.hbm %s1611_s1, %s932_s21 }
  0x29   : > { %p1616_p13 = scmp.ge.s32.totalorder %s1144_s12, 1  ;;  %s139_s3 = scalar_lea.vmem [#allocation5], %s931_s20 }
  0x2a   : > { %s146_s4 = sshll.u32 %s139_s3, 4  ;;  %s136_s25 = scalar_lea.sflag [#allocation6], %s1209_s19  ;;  %s1276_s4 = int_to_ptr.vmem [resolvable:$true] %s146_s4 }
  0x2b   : > { %p1270_p3 = pnand %p1616_p13, %p154_p9  ;;  %s1076_s27 = scalar_lea.hbm %s1266_s29, 768 }
  0x2c   : > { %p1077_p4 = scmp.ne.s32.totalorder %s1266_s29, %s1076_s27  ;;  %s1081_s28 = scalar_lea.hbm %s1611_s1, 1536 }
  0x2d   : > { %p1082_p10 = scmp.lt.u32.totalorder %s1266_s29, %s1611_s1  ;;  %p1083_p12 = scmp.lt.u32.totalorder %s1081_s28, %s1076_s27 }
  0x2e   : > { %p1079_p5 = pnand %p1077_p4, %p1048_p11  ;;  %p1085_p1 = scmp.lt.u32.totalorder %s1076_s27, %s1266_s29 }
  0x2f   : > { %p1084_p0 = por %p1083_p12, %p1082_p10 }
  0x30   : > { %p1080_p6 = pneg %p1079_p5 }
  0x31   : > { %p1086_p2 = por %p1085_p1, %p1084_p0 }
  0x33   : > { %p1087_p9 = pnand %p1086_p2, %p1080_p6 }
  0x35   : > { %1090 = shalt.err (!%p1087_p9)
}
  0x36   : > { %s1091_s20 = scalar_lea.vmem %s1276_s4, 768  ;;  %s1149_s7 = smov [#allocation5]  }
  0x37   : > { %p1092_p13 = scmp.ne.s32.totalorder %s1276_s4, %s1091_s20  ;;  %s1096_s8 = sshll.u32 %s1149_s7, 4  ;;  %s1097_s8 = int_to_ptr.vmem [resolvable:$false] %s1096_s8 }
  0x38   : > { %s1098_s9 = scalar_lea.vmem %s1097_s8, 1536  ;;  %p1099_p7 = scmp.lt.s32.totalorder %s1276_s4, %s1097_s8 }
  0x39   : > { %p1094_p4 = pnand %p1092_p13, %p1048_p11  ;;  %p1100_p10 = scmp.lt.s32.totalorder %s1098_s9, %s1091_s20 }
  0x3b   : > { %p1095_p5 = pneg %p1094_p4  ;;  %p1101_p12 = por %p1100_p10, %p1099_p7 }
  0x3d   : > { %p1102_p0 = pnand %p1101_p12, %p1095_p5 }
  0x3f   : > { %1105 = shalt.err (!%p1102_p0)
}
  0x40   : > { %996 = dma.hbm_to_vmem [thread:$0]  (!%p1213_p8), %s1266_s29, 768, %s1276_s4, %s136_s25, %s1147_s16, %s1147_s16, %s1148_s23  }
  0x41   : > { %158 = sbr.rel (%p1270_p3) target bundleno = 632 (0x278), region = 28  ;;  %s160_s15 = sand.u32 (!%p1270_p3), 1, %s1136_s10  }
  0x42   : > { %s935_s24 = smul.u32 (!%p1270_p3), 48, %s160_s15  ;;  %s161_s26 = scalar_lea.sflag (!%p1270_p3), [#allocation4], %s160_s15 }
  0x43   : > { %p1618_p7 = scmp.ne.s32.totalorder (!%p1270_p3), %s1614_s18, 0 }
  0x44   : > { %s164_s3 = scalar_lea.vmem (!%p1270_p3), [#allocation3], %s935_s24 }
  0x48   : > { %1123 = dma.done.wait (%p1618_p7), %s161_s26, 768  }
  0x49   : > { %1125 = vsyncadd (%p1618_p7), %s161_s26, 4294966528  ;;  %s170_s22 = scalar_lea.sflag [#allocation6], %s160_s15  ;;  %s1314_s19 = scalar_lea.vmem [#allocation5], %s935_s24 }
  0x4a   : > { %1127 = dma.done.wait (%p1618_p7), %s170_s22, 768  }
  0x4b   : > { %1129 = vsyncadd (%p1618_p7), %s170_s22, 4294966528  ;;  %v1150_v0 = vmov 0.0   ;;  %v1323_v1 = vld [vmem:[%s164_s3] sm:$0xff]  ;;  %v1325_v2 = vld [vmem:[%s164_s3 + $0x10] sm:$0xff]  ;;  %vm239_vm0 = vcmask 130048   ;;  %v251_v32 = vlaneseq  ;;  %s1151_s18 = smov 127  }
  0x4c   : > { %236 = vst [vmem:[#allocation2] sm:$0xff] %v1150_v0  ;;  %238 = vst [vmem:[#allocation2 + $0x10] sm:$0xff] %v1150_v0  ;;  %v1327_v3 = vld [vmem:[%s164_s3 + $0x20] sm:$0xff]  ;;  %v1330_v4 = vmul.f32 255.0, %v1323_v1  ;;  %v1333_v5 = vmul.f32 255.0, %v1325_v2  ;;  %v1338_v7 = vld [vmem:[%s164_s3 + $0x8] sm:$0xff] }
  0x4d   : > { %237 = vst [vmem:[#allocation2 + $0x8] sm:$0xff] %v1150_v0  ;;  %v1336_v6 = vmul.f32 255.0, %v1327_v3  ;;  %v1340_v8 = vld [vmem:[%s164_s3 + $0x18] sm:$0xff]  ;;  %v1342_v9 = vld [vmem:[%s164_s3 + $0x28] sm:$0xff]  ;;  %v1345_v10 = vmul.f32 255.0, %v1338_v7  ;;  %v1361_v34 = vshrl.u32 %v251_v32, 7 }
  0x4e   : > { %v1348_v11 = vmul.f32 255.0, %v1340_v8  ;;  %v1351_v12 = vmul.f32 255.0, %v1342_v9  ;;  %v206_v13 = vfloor.f32 %v1330_v4  ;;  %v213_v14 = vfloor.f32 %v1333_v5  ;;  %s1152_s16 = smov 1   ;;  %p198_p8 = scmp.lt.s32.totalorder %s1187_s13, 1 }
  0x4f   : > { %v220_v15 = vfloor.f32 %v1336_v6  ;;  %v207_v16 = vfloor.f32 %v1345_v10  ;;  %v1364_v35 = vrot.slane %v1150_v0, 7  ;;  %vm253_vm1 = vcmp.lt.s32.totalorder %v1361_v34, 1 }
  0x50   : > { %v214_v17 = vfloor.f32 %v1348_v11  ;;  %v221_v18 = vfloor.f32 %v1351_v12  ;;  %v222_v19 = vmul.f32 0.114, %v206_v13  ;;  %v224_v20 = vmul.f32 0.587, %v213_v14  ;;  %s1628_s13 = smov (!%p198_p8, %s1187_s13), 1 }
  0x51   : > { %v228_v21 = vmul.f32 0.299, %v220_v15  ;;  %v223_v22 = vmul.f32 0.114, %v207_v16  ;;  %v1375_v43 = vrot.slane %v1150_v0, 1  ;;  %vm299_vm2 = vcmp.lt.s32.totalorder %v1361_v34, 7 }
  0x52   : > { %v225_v23 = vmul.f32 0.587, %v214_v17  ;;  %v229_v24 = vmul.f32 0.299, %v221_v18  ;;  %v226_v25 = vadd.f32 %v224_v20, %v222_v19  ;;  %v1393_v62 = vand.u32 127, %v251_v32 }
  0x54   : > { %v227_v26 = vadd.f32 %v225_v23, %v223_v22  ;;  %v230_v27 = vadd.f32 %v228_v21, %v226_v25  ;;  %vm385_vm3 = vcmp.lt.s32.totalorder %v1393_v62, 16  ;;  %vm783_vm12 = vcmp.eq.s32.totalorder %v1393_v62, 0 }
  0x55   : > { %vm788_vm13 = vcmp.eq.s32.totalorder %v1393_v62, 1  ;;  %vm794_vm14 = vcmp.eq.s32.totalorder %v1393_v62, 2  ;;  %vm800_vm15 = vcmp.eq.s32.totalorder %v1393_v62, 3 }
  0x56   : > { %v231_v28 = vadd.f32 %v229_v24, %v227_v26  ;;  %v232_v29 = vadd.f32 0.5, %v230_v27 }
  0x58   : > { %v233_v30 = vadd.f32 0.5, %v231_v28  ;;  %v234_v31 = vfloor.f32 %v232_v29 }
  0x5a   : > { %v235_v33 = vfloor.f32 %v233_v30  ;;  %240 = vst.msk [vmem:[#allocation2] sm:$0xff] %vm239_vm0, %v234_v31 }
  0x5c   : > { %241 = vst.msk [vmem:[#allocation2 + $0x8] sm:$0xff] %vm239_vm0, %v235_v33 }
  0x61   : > { %v242_v36 = vld [vmem:[#allocation2] sm:$0xff] }
  0x62   : > { %v248_v37 = vrot.slane %v242_v36, 7  ;;  %v296_v44 = vrot.slane %v242_v36, 1  ;;  %v245_v49 = vmul.f32 -8.0, %v242_v36 }
  0x63   : > { %v243_v38 = vld [vmem:[#allocation2 + $0x8] sm:$0xff] }
  0x64   : > { %v249_v39 = vrot.slane %v243_v38, 7  ;;  %v256_v40 = vsel %vm253_vm1, %v1364_v35, %v248_v37  ;;  %v297_v42 = vrot.slane %v243_v38, 1  ;;  %v246_v51 = vmul.f32 -8.0, %v243_v38 }
  0x65   : > { %275 = vrot.lane.b32.xlu1 %v256_v40, %s1151_s18  ;;  %257 = vrot.lane.b32.xlu0 %v256_v40, %s1152_s16  ;;  %v366_v19 = vmul.f32 -2.0, %v256_v40 }
  0x66   : > { %v255_v41 = vsel %vm253_vm1, %v248_v37, %v249_v39  ;;  %v300_v45 = vsel %vm299_vm2, %v297_v42, %v1375_v43  ;;  %v301_v46 = vsel %vm299_vm2, %v296_v44, %v297_v42 }
  0x67   : > { %v367_v23 = vmul.f32 -2.0, %v255_v41  ;;  %v373_v24 = vmul.f32 2.0, %v300_v45  ;;  %v372_v39 = vmul.f32 2.0, %v301_v46 }
  0x69   : > { %277 = vrot.lane.b32.xlu1 %v255_v41, %s1151_s18  ;;  %259 = vrot.lane.b32.xlu0 %v255_v41, %s1152_s16 }
  0x6d   : > { %305 = vrot.lane.b32.xlu1 %v300_v45, %s1152_s16  ;;  %303 = vrot.lane.b32.xlu0 %v301_v46, %s1152_s16 }
  0x71   : > { %326 = vrot.lane.b32.xlu1 %v300_v45, %s1151_s18  ;;  %324 = vrot.lane.b32.xlu0 %v301_v46, %s1151_s18 }
  0x75   : > { %344 = vrot.lane.b32.xlu1 %v243_v38, %s1152_s16  ;;  %342 = vrot.lane.b32.xlu0 %v242_v36, %s1152_s16 }
  0x79   : > { %356 = vrot.lane.b32.xlu1 %v243_v38, %s1151_s18  ;;  %354 = vrot.lane.b32.xlu0 %v242_v36, %s1151_s18 }
  0xd7   : > { %v276_v47 = vpop.permute.xlu1 %275  ;;  %v258_v48 = vpop.permute.xlu0 %257 }
  0xd8   : > { %v263_v50 = vmul.f32 2.0, %v258_v48  ;;  %v290_v56 = vmul.f32 -1.0, %v276_v47  ;;  %v269_v57 = vmul.f32 -1.0, %v258_v48  ;;  %v281_v15 = vmul.f32 2.0, %v276_v47 }
  0xda   : > { %v266_v59 = vadd.f32 %v263_v50, %v245_v49  ;;  %v293_v20 = vadd.f32 %v290_v56, %v269_v57  ;;  %v287_v27 = vadd.f32 %v276_v47, %v269_v57 }
  0xdb   : > { %v278_v52 = vpop.permute.xlu1 %277  ;;  %v260_v53 = vpop.permute.xlu0 %259 }
  0xdc   : > { %v291_v54 = vmul.f32 -1.0, %v278_v52  ;;  %v264_v55 = vmul.f32 2.0, %v260_v53  ;;  %v270_v58 = vmul.f32 -1.0, %v260_v53  ;;  %v282_v60 = vmul.f32 2.0, %v278_v52 }
  0xdd   : > { %v284_v25 = vadd.f32 %v281_v15, %v266_v59 }
  0xde   : > { %v267_v61 = vadd.f32 %v264_v55, %v246_v51  ;;  %v294_v63 = vadd.f32 %v291_v54, %v270_v58  ;;  %v288_v28 = vadd.f32 %v278_v52, %v270_v58 }
  0xdf   : > { %v306_v13 = vpop.permute.xlu1 %305  ;;  %v304_v14 = vpop.permute.xlu0 %303 }
  0xe0   : > { %v285_v16 = vadd.f32 %v282_v60, %v267_v61  ;;  %v310_v17 = vmul.f32 2.0, %v306_v13  ;;  %v309_v18 = vmul.f32 2.0, %v304_v14  ;;  %v316_v21 = vmul.f32 -1.0, %v306_v13 }
  0xe1   : > { %v315_v22 = vmul.f32 -1.0, %v304_v14  ;;  %v322_v26 = vadd.f32 %v306_v13, %v294_v63  ;;  %v321_v30 = vadd.f32 %v304_v14, %v293_v20 }
  0xe2   : > { %v313_v29 = vadd.f32 %v310_v17, %v285_v16  ;;  %v312_v33 = vadd.f32 %v309_v18, %v284_v25  ;;  %v319_v42 = vadd.f32 %v316_v21, %v288_v28 }
  0xe3   : > { %v327_v31 = vpop.permute.xlu1 %326  ;;  %v325_v32 = vpop.permute.xlu0 %324  ;;  %v318_v40 = vadd.f32 %v315_v22, %v287_v27 }
  0xe4   : > { %v331_v36 = vmul.f32 2.0, %v327_v31  ;;  %v340_v37 = vadd.f32 %v327_v31, %v322_v26  ;;  %v330_v38 = vmul.f32 2.0, %v325_v32  ;;  %v339_v44 = vadd.f32 %v325_v32, %v321_v30 }
  0xe5   : > { %v337_v55 = vadd.f32 %v327_v31, %v319_v42  ;;  %v336_v56 = vadd.f32 %v325_v32, %v318_v40 }
  0xe6   : > { %v334_v48 = vadd.f32 %v331_v36, %v313_v29  ;;  %v370_v49 = vadd.f32 %v367_v23, %v340_v37  ;;  %v333_v41 = vadd.f32 %v330_v38, %v312_v33  ;;  %v369_v45 = vadd.f32 %v366_v19, %v339_v44 }
  0xe7   : > { %v345_v47 = vpop.permute.xlu1 %344  ;;  %v343_v50 = vpop.permute.xlu0 %342 }
  0xe8   : > { %v390_v51 = vand.u32 2147483647, %v334_v48  ;;  %v389_v52 = vand.u32 2147483647, %v333_v41  ;;  %v349_v53 = vmul.f32 -2.0, %v345_v47  ;;  %v348_v54 = vmul.f32 -2.0, %v343_v50 }
  0xe9   : > { %v376_v57 = vadd.f32 %v373_v24, %v370_v49  ;;  %v375_v58 = vadd.f32 %v372_v39, %v369_v45 }
  0xea   : > { %v393_v46 = vmin.f32 %v390_v51, 255.0  ;;  %v392_v59 = vmin.f32 %v389_v52, 255.0  ;;  %v352_v60 = vadd.f32 %v349_v53, %v337_v55  ;;  %v351_v61 = vadd.f32 %v348_v54, %v336_v56  ;;  %v918_v56 = vld [vmem:[%s1314_s19 + $0x10] sm:$0xff] }
  0xeb   : > { %v357_v63 = vpop.permute.xlu1 %356  ;;  %v355_v13 = vpop.permute.xlu0 %354  ;;  %v402_v23 = vand.u32 2147483647, %v376_v57  ;;  %v401_v24 = vand.u32 2147483647, %v375_v58  ;;  %v919_v57 = vld [vmem:[%s1314_s19 + $0x18] sm:$0xff] }
  0xec   : > { %v396_v14 = vsel %vm385_vm3, %v393_v46, 0.0  ;;  %v361_v15 = vmul.f32 2.0, %v357_v63  ;;  %v360_v16 = vmul.f32 2.0, %v355_v13  ;;  %v395_v17 = vsel %vm385_vm3, %v392_v59, 0.0  ;;  %v510_v59 = vld [vmem:[%s1314_s19] sm:$0xff] }
  0xed   : > { %v445_v18 = vrot.slane %v396_v14, 7  ;;  %v450_v19 = vrot.slane %v396_v14, 1  ;;  %v444_v20 = vrot.slane %v395_v17, 7  ;;  %v449_v21 = vrot.slane %v395_v17, 1 }
  0xee   : > { %v364_v22 = vadd.f32 %v361_v15, %v352_v60  ;;  %v363_v25 = vadd.f32 %v360_v16, %v351_v61  ;;  %v605_v34 = vsub.f32 %v1340_v8, %v919_v57  ;;  %v511_v60 = vld [vmem:[%s1314_s19 + $0x8] sm:$0xff]  ;;  %v512_v61 = vsub.f32 %v1323_v1, %v510_v59 }
  0xef   : > { %v448_v26 = vsel %vm253_vm1, %v1364_v35, %v444_v20  ;;  %v453_v27 = vsel %vm299_vm2, %v449_v21, %v450_v19  ;;  %v447_v28 = vsel %vm253_vm1, %v444_v20, %v445_v18  ;;  %v452_v29 = vsel %vm299_vm2, %v450_v19, %v1375_v43 }
  0xf0   : > { %v399_v30 = vand.u32 2147483647, %v364_v22  ;;  %v398_v31 = vand.u32 2147483647, %v363_v25  ;;  %v454_v32 = vmax.f32 %v448_v26, %v453_v27  ;;  %v455_v33 = vmax.f32 %v447_v28, %v452_v29 }
  0xf1   : > { %v607_v46 = vand.u32 2147483647, %v605_v34  ;;  %v513_v63 = vsub.f32 %v1338_v7, %v511_v60  ;;  %v514_v15 = vand.u32 2147483647, %v512_v61  ;;  %v625_v19 = vmul.f32 255.0, %v918_v56 }
  0xf2   : > { %v405_v36 = vadd.f32 %v402_v23, %v399_v30  ;;  %v404_v37 = vadd.f32 %v401_v24, %v398_v31  ;;  %v1410_v38 = vmax.f32 %v395_v17, %v454_v32  ;;  %v1412_v39 = vmax.f32 %v396_v14, %v455_v33  ;;  %v1460_v23 = vld [vmem:[%s1314_s19 + $0x20] sm:$0xff]  ;;  %v1466_v30 = vld [vmem:[%s1314_s19 + $0x28] sm:$0xff] }
  0xf3   : > { %v609_v14 = vsel %vm239_vm0, %v607_v46, 0.0  ;;  %v515_v16 = vand.u32 2147483647, %v513_v63  ;;  %v626_v1 = vmul.f32 255.0, %v919_v57  ;;  %v533_v20 = vmul.f32 255.0, %v510_v59 }
  0xf4   : > { %vm408_vm4 = vcmp.gt.f32.partialorder %v405_v36, 100.0  ;;  %vm407_vm5 = vcmp.gt.f32.partialorder %v404_v37, 100.0  ;;  %458 = vrot.lane.b32.xlu0 %v1410_v38, %s1152_s16  ;;  %460 = vrot.lane.b32.xlu1 %v1412_v39, %s1152_s16  ;;  %v534_v7 = vmul.f32 255.0, %v511_v60  ;;  %v960_v21 = vtrunc.f32 %v1333_v5 }
  0xf5   : > { %vm411_vm6 = vmand %vm385_vm3, %vm408_vm4  ;;  %v517_v8 = vsel %vm239_vm0, %v515_v16, 0.0  ;;  %v964_v22 = vtrunc.f32 %v625_v19  ;;  %v962_v26 = vtrunc.f32 %v1348_v11  ;;  %v966_v27 = vtrunc.f32 %v626_v1 }
  0xf6   : > { %v414_v42 = vsel %vm411_vm6, 1.0, %v1150_v0  ;;  %vm410_vm7 = vmand %vm385_vm3, %vm407_vm5  ;;  %v946_v28 = vtrunc.f32 %v1330_v4  ;;  %v948_v29 = vtrunc.f32 %v1345_v10  ;;  %v950_v31 = vtrunc.f32 %v533_v20 }
  0xf7   : > { %v417_v40 = vrot.slane %v414_v42, 7  ;;  %v422_v44 = vrot.slane %v414_v42, 1  ;;  %v413_v48 = vsel %vm410_vm7, 1.0, %v1150_v0  ;;  %v952_v32 = vtrunc.f32 %v534_v7 }
  0xf8   : > { %v416_v49 = vrot.slane %v413_v48, 7  ;;  %v421_v41 = vrot.slane %v413_v48, 1  ;;  %462 = vrot.lane.b32.xlu0 %v1410_v38, %s1151_s18  ;;  %464 = vrot.lane.b32.xlu1 %v1412_v39, %s1151_s18  ;;  %v717_v33 = vmul.f32 255.0, %v1460_v23  ;;  %v1469_v36 = vcvt.f32.s32 %v960_v21 }
  0xf9   : > { %v424_v45 = vsel %vm299_vm2, %v422_v44, %v1375_v43  ;;  %v1471_v5 = vcvt.f32.s32 %v964_v22  ;;  %v1475_v11 = vcvt.f32.s32 %v966_v27  ;;  %v718_v4 = vmul.f32 255.0, %v1466_v30 }
  0xfa   : > { %v419_v47 = vsel %vm253_vm1, %v416_v49, %v417_v40  ;;  %v420_v50 = vsel %vm253_vm1, %v1364_v35, %v416_v49  ;;  %v425_v51 = vsel %vm299_vm2, %v421_v41, %v422_v44  ;;  %v604_v35 = vsub.f32 %v1325_v2, %v918_v56 }
  0xfb   : > { %v426_v52 = vmax.f32 %v420_v50, %v425_v51  ;;  %v427_v53 = vmax.f32 %v419_v47, %v424_v45  ;;  %v516_v2 = vsel %vm239_vm0, %v514_v15, 0.0  ;;  %v1473_v40 = vcvt.f32.s32 %v962_v26 }
  0xfc   : > { %v606_v58 = vand.u32 2147483647, %v604_v35  ;;  %v518_v18 = vadd.f32 %v517_v8, %v516_v2  ;;  %v947_v44 = vcvt.f32.s32 %v946_v28  ;;  %v949_v49 = vcvt.f32.s32 %v948_v29 }
  0xfd   : > { %v1438_v54 = vmax.f32 %v413_v48, %v426_v52  ;;  %v1440_v55 = vmax.f32 %v414_v42, %v427_v53  ;;  %v629_v41 = vsub.s32 %v1469_v36, %v1471_v5  ;;  %v951_v45 = vcvt.f32.s32 %v950_v31 }
  0xfe   : > { %v608_v13 = vsel %vm239_vm0, %v606_v58, 0.0  ;;  %v953_v47 = vcvt.f32.s32 %v952_v32  ;;  %v974_v50 = vtrunc.f32 %v1336_v6  ;;  %v978_v51 = vtrunc.f32 %v717_v33 }
  0xff   : > { %v1035_v43 = vpack.i.bf16 %v1440_v55, %v1438_v54  ;;  %v610_v17 = vadd.f32 %v609_v14, %v608_v13  ;;  %v976_v56 = vtrunc.f32 %v1351_v12  ;;  %v537_v57 = vsub.s32 %v947_v44, %v951_v45 }
 0x100   : > { %v538_v35 = vsub.s32 %v949_v49, %v953_v47  ;;  %v980_v34 = vtrunc.f32 %v718_v4  ;;  %v1486_v59 = vand.u32 255, %v629_v41  ;;  %v1488_v60 = vcvt.f32.s32 %v974_v50 }
 0x101   : > { %1036 = vrot.lane.b32.xlu0 %v1035_v43, %s1152_s16  ;;  %1041 = vrot.lane.b32.xlu1 %v1035_v43, %s1151_s18  ;;  %v630_v43 = vsub.s32 %v1473_v40, %v1475_v11  ;;  %v1490_v6 = vcvt.f32.s32 %v978_v51  ;;  %v1496_v63 = vcvt.f32.s32 %v976_v56  ;;  %v539_v13 = vand.u32 255, %v537_v57 }
 0x102   : > { %v540_v12 = vand.u32 255, %v538_v35  ;;  %v1498_v14 = vcvt.f32.s32 %v980_v34 }
 0x103   : > { %v721_v15 = vsub.s32 %v1488_v60, %v1490_v6 }
 0x104   : > { %v722_v4 = vsub.s32 %v1496_v63, %v1498_v14 }
 0x105   : > { %v723_v41 = vand.u32 255, %v721_v15 }
 0x120   : > { %611 = vadd.xlane.f32.xlu0 %v610_v17 }
 0x125   : > { %519 = vadd.xlane.f32.xlu1 %v518_v18 }
 0x166   : > { %v459_v24 = vpop.permute.xlu0 %458  ;;  %v461_v25 = vpop.permute.xlu1 %460 }
 0x16a   : > { %v463_v37 = vpop.permute.xlu0 %462  ;;  %v465_v42 = vpop.permute.xlu1 %464 }
 0x16b   : > { %v466_v10 = vmax.f32 %v459_v24, %v463_v37  ;;  %v467_v48 = vmax.f32 %v461_v25, %v465_v42 }
 0x16d   : > { %v468_v52 = vmax.f32 %v1410_v38, %v466_v10  ;;  %v469_v53 = vmax.f32 %v1412_v39, %v467_v48  ;;  %v632_v39 = vand.u32 255, %v630_v43 }
 0x16f   : > { %v936_v58 = vtrunc.f32 %v468_v52  ;;  %v938_v46 = vtrunc.f32 %v469_v53 }
 0x171   : > { %v1492_v61 = vcvt.f32.s32 %v936_v58  ;;  %v1494_v38 = vcvt.f32.s32 %v938_v46 }
 0x173   : > { %v1037_v16 = vpop.permute.xlu0 %1036  ;;  %v1042_v17 = vpop.permute.xlu1 %1041  ;;  %vm489_vm8 = vcmp.gt.s32.totalorder %v1492_v61, 0  ;;  %vm490_vm9 = vcmp.gt.s32.totalorder %v1494_v38, 0  ;;  %v567_v2 = vand.u32 %v947_v44, %v1492_v61  ;;  %v568_v8 = vand.u32 %v949_v49, %v1494_v38 }
 0x174   : > { %v1039_v18 = vunpack.i.h.bf16 %v1037_v16  ;;  %v1038_v19 = vunpack.i.l.bf16 %v1037_v16  ;;  %v1044_v1 = vunpack.i.h.bf16 %v1042_v17  ;;  %v1043_v20 = vunpack.i.l.bf16 %v1042_v17 }
 0x175   : > { %v914_v7 = vsel %vm489_vm8, 1.0, %v1150_v0  ;;  %v915_v21 = vsel %vm490_vm9, 1.0, %v1150_v0  ;;  %v569_v22 = vand.u32 %v951_v45, %v1492_v61  ;;  %v570_v24 = vand.u32 %v953_v47, %v1494_v38 }
 0x176   : > { %v439_v25 = vmax.f32 %v1039_v18, %v1044_v1  ;;  %v438_v26 = vmax.f32 %v1038_v19, %v1043_v20  ;;  %v495_v27 = vsel %vm239_vm0, %v914_v7, 0.0  ;;  %v496_v28 = vsel %vm239_vm0, %v915_v21, 0.0 }
 0x177   : > { %v497_v29 = vadd.f32 %v496_v28, %v495_v27  ;;  %v571_v31 = vsub.s32 %v567_v2, %v569_v22  ;;  %v572_v32 = vsub.s32 %v568_v8, %v570_v24  ;;  %v659_v33 = vand.u32 %v1469_v36, %v1492_v61 }
 0x178   : > { %v441_v37 = vmax.f32 %v1440_v55, %v439_v25  ;;  %v440_v42 = vmax.f32 %v1438_v54, %v438_v26  ;;  %v661_v44 = vand.u32 %v1471_v5, %v1492_v61  ;;  %v660_v49 = vand.u32 %v1473_v40, %v1494_v38 }
 0x179   : > { %498 = vadd.xlane.f32.xlu0 %v497_v29  ;;  %v573_v10 = vand.u32 255, %v571_v31  ;;  %v574_v48 = vand.u32 255, %v572_v32  ;;  %v662_v54 = vand.u32 %v1475_v11, %v1494_v38  ;;  %v724_v16 = vand.u32 255, %v722_v4 }
 0x17a   : > { %vm1522_vm10 = vcmp.gt.f32.partialorder %v441_v37, 0.0  ;;  %vm1526_vm11 = vcmp.gt.f32.partialorder %v440_v42, 0.0  ;;  %v663_v36 = vsub.s32 %v659_v33, %v661_v44  ;;  %v752_v25 = vand.u32 %v1496_v63, %v1494_v38 }
 0x17b   : > { %v912_v5 = vsel %vm1526_vm11, 1.0, %v1150_v0  ;;  %v913_v40 = vsel %vm1522_vm10, 1.0, %v1150_v0  ;;  %v541_v47 = vsel %vm1526_vm11, %v539_v13, 0  ;;  %v542_v50 = vsel %vm1522_vm10, %v540_v12, 0 }
 0x17c   : > { %v476_v51 = vsel %vm239_vm0, %v912_v5, 0.0  ;;  %v477_v52 = vsel %vm239_vm0, %v913_v40, 0.0  ;;  %v543_v11 = vsel %vm239_vm0, %v541_v47, 0  ;;  %v544_v53 = vsel %vm239_vm0, %v542_v50, 0 }
 0x17d   : > { %v478_v43 = vadd.f32 %v477_v52, %v476_v51  ;;  %v545_v56 = vadd.s32 %v544_v53, %v543_v11  ;;  %v575_v57 = vsel %vm239_vm0, %v573_v10, 0  ;;  %v576_v0 = vsel %vm239_vm0, %v574_v48, 0 }
 0x17e   : > { %v577_v35 = vadd.s32 %v576_v0, %v575_v57  ;;  %v633_v34 = vsel %vm1526_vm11, %v1486_v59, 0  ;;  %v634_v58 = vsel %vm1522_vm10, %v632_v39, 0  ;;  %v664_v46 = vsub.s32 %v660_v49, %v662_v54 }
 0x17f   : > { %479 = vadd.xlane.f32.xlu1 %v478_v43  ;;  %v547_v13 = vshrl.u32 %v545_v56, 16  ;;  %v635_v12 = vsel %vm239_vm0, %v633_v34, 0  ;;  %v636_v15 = vsel %vm239_vm0, %v634_v58, 0  ;;  %v665_v8 = vand.u32 255, %v663_v36 }
 0x180   : > { %v579_v17 = vshrl.u32 %v577_v35, 16  ;;  %v637_v2 = vadd.s32 %v636_v15, %v635_v12  ;;  %v578_v19 = vand.u32 65535, %v577_v35  ;;  %v666_v1 = vand.u32 255, %v664_v46 }
 0x181   : > { %v549_v18 = vcvt.s32.f32 %v547_v13  ;;  %v667_v59 = vsel %vm239_vm0, %v665_v8, 0  ;;  %v751_v39 = vand.u32 %v1488_v60, %v1492_v61  ;;  %v725_v22 = vsel %vm1526_vm11, %v723_v41, 0 }
 0x182   : > { %v581_v20 = vcvt.s32.f32 %v579_v17  ;;  %v639_v7 = vshrl.u32 %v637_v2, 16  ;;  %v668_v21 = vsel %vm239_vm0, %v666_v1, 0  ;;  %v726_v24 = vsel %vm1522_vm10, %v724_v16, 0 }
 0x183   : > { %552 = vadd.xlane.f32.xlu0 %v549_v18  ;;  %v669_v26 = vadd.s32 %v668_v21, %v667_v59  ;;  %v753_v27 = vand.u32 %v1490_v6, %v1492_v61  ;;  %v580_v29 = vcvt.s32.f32 %v578_v19  ;;  %v546_v60 = vand.u32 65535, %v545_v56 }
 0x184   : > { %584 = vadd.xlane.f32.xlu1 %v581_v20  ;;  %v641_v28 = vcvt.s32.f32 %v639_v7  ;;  %v754_v31 = vand.u32 %v1498_v14, %v1494_v38  ;;  %v727_v33 = vsel %vm239_vm0, %v725_v22, 0  ;;  %v728_v37 = vsel %vm239_vm0, %v726_v24, 0 }
 0x185   : > { %v671_v32 = vshrl.u32 %v669_v26, 16  ;;  %v755_v42 = vsub.s32 %v751_v39, %v753_v27  ;;  %v548_v4 = vcvt.s32.f32 %v546_v60  ;;  %v638_v10 = vand.u32 65535, %v637_v2 }
 0x186   : > { %v756_v44 = vsub.s32 %v752_v25, %v754_v31  ;;  %v729_v48 = vadd.s32 %v728_v37, %v727_v33  ;;  %v670_v49 = vand.u32 65535, %v669_v26  ;;  %v696_v45 = vsub.f32 %v1327_v3, %v1460_v23 }
 0x187   : > { %644 = vadd.xlane.f32.xlu0 %v641_v28  ;;  %v757_v63 = vand.u32 255, %v755_v42  ;;  %v673_v61 = vcvt.s32.f32 %v671_v32  ;;  %v697_v55 = vsub.f32 %v1342_v9, %v1466_v30  ;;  %v640_v54 = vcvt.s32.f32 %v638_v10 }
 0x188   : > { %582 = vadd.xlane.f32.xlu1 %v580_v29  ;;  %v758_v6 = vand.u32 255, %v756_v44  ;;  %v731_v36 = vshrl.u32 %v729_v48, 16  ;;  %v672_v5 = vcvt.s32.f32 %v670_v49  ;;  %v698_v47 = vand.u32 2147483647, %v696_v45 }
 0x189   : > { %v759_v41 = vsel %vm239_vm0, %v757_v63, 0  ;;  %v699_v50 = vand.u32 2147483647, %v697_v55  ;;  %v730_v52 = vand.u32 65535, %v729_v48 }
 0x18a   : > { %v760_v38 = vsel %vm239_vm0, %v758_v6, 0  ;;  %v733_v51 = vcvt.s32.f32 %v731_v36  ;;  %v700_v43 = vsel %vm239_vm0, %v698_v47, 0.0 }
 0x18b   : > { %550 = vadd.xlane.f32.xlu0 %v548_v4  ;;  %v761_v14 = vadd.s32 %v760_v38, %v759_v41  ;;  %v701_v3 = vsel %vm239_vm0, %v699_v50, 0.0  ;;  %v732_v23 = vcvt.s32.f32 %v730_v52  ;;  %vm806_vm0 = vcmp.eq.s32.totalorder %v1393_v62, 4 }
 0x18c   : > { %676 = vadd.xlane.f32.xlu1 %v673_v61  ;;  %v702_v30 = vadd.f32 %v701_v3, %v700_v43 }
 0x18d   : > { %v763_v40 = vshrl.u32 %v761_v14, 16  ;;  %v762_v53 = vand.u32 65535, %v761_v14 }
 0x18f   : > { %642 = vadd.xlane.f32.xlu0 %v640_v54  ;;  %v765_v11 = vcvt.s32.f32 %v763_v40  ;;  %v764_v9 = vcvt.s32.f32 %v762_v53 }
 0x190   : > { %674 = vadd.xlane.f32.xlu1 %v672_v5 }
 0x193   : > { %736 = vadd.xlane.f32.xlu0 %v733_v51 }
 0x194   : > { %768 = vadd.xlane.f32.xlu1 %v765_v11 }
 0x197   : > { %734 = vadd.xlane.f32.xlu0 %v732_v23 }
 0x198   : > { %766 = vadd.xlane.f32.xlu1 %v764_v9 }
 0x19b   : > { %703 = vadd.xlane.f32.xlu0 %v702_v30 }
 0x1ad   : > { %v612_v56 = vpop.xlane.xlu0 %611 }
 0x1ae   : > { %v613_v59 = vrot.slane %v612_v56, 4 }
 0x1b0   : > { %v614_v60 = vadd.f32 %v613_v59, %v612_v56 }
 0x1b2   : > { %v520_v57 = vpop.xlane.xlu1 %519  ;;  %v615_v61 = vrot.slane %v614_v60, 2 }
 0x1b3   : > { %v521_v0 = vrot.slane %v520_v57, 4 }
 0x1b4   : > { %v616_v11 = vadd.f32 %v615_v61, %v614_v60 }
 0x1b5   : > { %v522_v46 = vadd.f32 %v521_v0, %v520_v57 }
 0x1b7   : > { %v523_v15 = vrot.slane %v522_v46, 2 }
 0x1b9   : > { %v524_v1 = vadd.f32 %v523_v15, %v522_v46 }
 0x1bb   : > { %v525_v26 = vrot.slane %v524_v1, 1 }
 0x1bd   : > { %v526_v4 = vadd.f32 %v525_v26, %v524_v1 }
 0x206   : > { %v499_v35 = vpop.xlane.xlu0 %498 }
 0x207   : > { %v500_v34 = vrot.slane %v499_v35, 4 }
 0x209   : > { %v501_v58 = vadd.f32 %v500_v34, %v499_v35 }
 0x20b   : > { %v502_v13 = vrot.slane %v501_v58, 2 }
 0x20c   : > { %v480_v12 = vpop.xlane.xlu1 %479 }
 0x20d   : > { %v481_v16 = vrot.slane %v480_v12, 4  ;;  %v503_v8 = vadd.f32 %v502_v13, %v501_v58  ;;  %v617_v58 = vrot.slane %v616_v11, 1 }
 0x20f   : > { %v482_v17 = vadd.f32 %v481_v16, %v480_v12  ;;  %v504_v21 = vrot.slane %v503_v8, 1 }
 0x210   : > { %v553_v2 = vpop.xlane.xlu0 %552 }
 0x211   : > { %v483_v18 = vrot.slane %v482_v17, 2  ;;  %v585_v19 = vpop.xlane.xlu1 %584  ;;  %v555_v22 = vcvt.f32.s32 %v553_v2  ;;  %v505_v33 = vadd.f32 %v504_v21, %v503_v8 }
 0x212   : > { %v587_v20 = vcvt.f32.s32 %v585_v19 }
 0x213   : > { %v484_v7 = vadd.f32 %v483_v18, %v482_v17  ;;  %v556_v37 = vshll.u32 %v555_v22, 16 }
 0x214   : > { %v645_v39 = vpop.xlane.xlu0 %644  ;;  %v588_v27 = vshll.u32 %v587_v20, 16 }
 0x215   : > { %v583_v24 = vpop.xlane.xlu1 %582  ;;  %v485_v25 = vrot.slane %v484_v7, 1  ;;  %v647_v42 = vcvt.f32.s32 %v645_v39 }
 0x216   : > { %v586_v28 = vcvt.f32.s32 %v583_v24  ;;  %v618_v24 = vadd.f32 %v617_v58, %v616_v11 }
 0x217   : > { %v486_v29 = vadd.f32 %v485_v25, %v484_v7  ;;  %v648_v38 = vshll.u32 %v647_v42, 16 }
 0x218   : > { %v589_v31 = vadd.s32 %v588_v27, %v586_v28  ;;  %v551_v32 = vpop.xlane.xlu0 %550 }
 0x219   : > { %v554_v44 = vcvt.f32.s32 %v551_v32  ;;  %v677_v63 = vpop.xlane.xlu1 %676  ;;  %940 = vpush %v486_v29 }
 0x21a   : > { %v590_v10 = vrot.slane %v589_v31, 4  ;;  %v679_v48 = vcvt.f32.s32 %v677_v63  ;;  %942 = vpush %v505_v33 }
 0x21b   : > { %v557_v6 = vadd.s32 %v556_v37, %v554_v44  ;;  %944 = vpush %v526_v4 }
 0x21c   : > { %v591_v49 = vadd.s32 %v590_v10, %v589_v31  ;;  %v643_v41 = vpop.xlane.xlu0 %642  ;;  %v680_v54 = vshll.u32 %v679_v48, 16 }
 0x21d   : > { %v558_v14 = vrot.slane %v557_v6, 4  ;;  %v646_v45 = vcvt.f32.s32 %v643_v41  ;;  %v675_v55 = vpop.xlane.xlu1 %674 }
 0x21e   : > { %v678_v36 = vcvt.f32.s32 %v675_v55  ;;  %v592_v5 = vrot.slane %v591_v49, 2 }
 0x21f   : > { %v559_v40 = vadd.s32 %v558_v14, %v557_v6  ;;  %v649_v47 = vadd.s32 %v648_v38, %v646_v45  ;;  %v1045_v38 = vld [vmem:[#allocation2 + $0x10] sm:$0xff] }
 0x220   : > { %v681_v50 = vadd.s32 %v680_v54, %v678_v36  ;;  %v737_v51 = vpop.xlane.xlu0 %736  ;;  %v593_v52 = vadd.s32 %v592_v5, %v591_v49  ;;  %v924_v14 = vsel %vm783_vm12, 1.0, %v1045_v38  ;;  %v925_v55 = vsel %vm788_vm13, 1.0, %v1045_v38 }
 0x221   : > { %v650_v53 = vrot.slane %v649_v47, 4  ;;  %v739_v43 = vcvt.f32.s32 %v737_v51  ;;  %v769_v3 = vpop.xlane.xlu1 %768  ;;  %v560_v23 = vrot.slane %v559_v40, 2  ;;  %v926_v54 = vsel %vm794_vm14, 1.0, %v1045_v38 }
 0x222   : > { %v682_v9 = vrot.slane %v681_v50, 4  ;;  %v771_v30 = vcvt.f32.s32 %v769_v3  ;;  %v594_v34 = vrot.slane %v593_v52, 1 }
 0x223   : > { %v651_v56 = vadd.s32 %v650_v53, %v649_v47  ;;  %v561_v57 = vadd.s32 %v560_v23, %v559_v40  ;;  %v740_v46 = vshll.u32 %v739_v43, 16  ;;  %v928_v53 = vsel %vm806_vm0, 1.0, %v1045_v38 }
 0x224   : > { %v683_v0 = vadd.s32 %v682_v9, %v681_v50  ;;  %v735_v35 = vpop.xlane.xlu0 %734  ;;  %v772_v17 = vshll.u32 %v771_v30, 16  ;;  %v595_v59 = vadd.s32 %v594_v34, %v593_v52  ;;  %v927_v50 = vsel %vm800_vm15, 1.0, %v1045_v38 }
 0x225   : > { %v738_v13 = vcvt.f32.s32 %v735_v35  ;;  %v767_v12 = vpop.xlane.xlu1 %766  ;;  %v562_v15 = vrot.slane %v561_v57, 1  ;;  %v652_v16 = vrot.slane %v651_v56, 2 }
 0x226   : > { %v770_v2 = vcvt.f32.s32 %v767_v12  ;;  %v684_v8 = vrot.slane %v683_v0, 2 }
 0x227   : > { %v741_v18 = vadd.s32 %v740_v46, %v738_v13  ;;  %v563_v19 = vadd.s32 %v562_v15, %v561_v57  ;;  %v653_v1 = vadd.s32 %v652_v16, %v651_v56 }
 0x228   : > { %v773_v20 = vadd.s32 %v772_v17, %v770_v2  ;;  %v704_v7 = vpop.xlane.xlu0 %703  ;;  %v685_v39 = vadd.s32 %v684_v8, %v683_v0 }
 0x229   : > { %v742_v21 = vrot.slane %v741_v18, 4  ;;  %v705_v22 = vrot.slane %v704_v7, 4  ;;  %954 = vpush %v563_v19  ;;  %v654_v25 = vrot.slane %v653_v1, 1 }
 0x22a   : > { %v774_v26 = vrot.slane %v773_v20, 4  ;;  %956 = vpush %v595_v59  ;;  %v686_v27 = vrot.slane %v685_v39, 1 }
 0x22b   : > { %v743_v28 = vadd.s32 %v742_v21, %v741_v18  ;;  %v706_v29 = vadd.f32 %v705_v22, %v704_v7  ;;  %958 = vpush %v618_v24  ;;  %v655_v60 = vadd.s32 %v654_v25, %v653_v1 }
 0x22c   : > { %v775_v31 = vadd.s32 %v774_v26, %v773_v20  ;;  %v687_v32 = vadd.s32 %v686_v27, %v685_v39 }
 0x22d   : > { %v707_v33 = vrot.slane %v706_v29, 2  ;;  %968 = vpush %v655_v60  ;;  %v744_v37 = vrot.slane %v743_v28, 2 }
 0x22e   : > { %970 = vpush %v687_v32  ;;  %v776_v42 = vrot.slane %v775_v31, 2 }
 0x22f   : > { %v708_v44 = vadd.f32 %v707_v33, %v706_v29  ;;  %v745_v63 = vadd.s32 %v744_v37, %v743_v28 }
 0x230   : > { %v777_v4 = vadd.s32 %v776_v42, %v775_v31 }
 0x231   : > { %v709_v10 = vrot.slane %v708_v44, 1  ;;  %v746_v48 = vrot.slane %v745_v63, 1 }
 0x232   : > { %v778_v6 = vrot.slane %v777_v4, 1 }
 0x233   : > { %v710_v61 = vadd.f32 %v709_v10, %v708_v44  ;;  %v747_v49 = vadd.s32 %v746_v48, %v745_v63 }
 0x234   : > { %v779_v41 = vadd.s32 %v778_v6, %v777_v4 }
 0x235   : > { %972 = vpush %v710_v61 }
 0x236   : > { %982 = vpush %v747_v49 }
 0x237   : > { %984 = vpush %v779_v41 }
 0x24a   : > { %s1579_s23 = spop %940 }
 0x24b   : > { %s1581_s29 = spop %942  ;;  %s488_s5 = smul.f32 3.0, %s1579_s23 }
 0x24c   : > { %s945_s30 = spop %944 }
 0x24d   : > { %v797_v36 = vstv %s488_s5 }
 0x24e   : > { %v798_v52 = vmul.f32 %v926_v54, %v797_v36 }
 0x25a   : > { %s955_s4 = spop %954 }
 0x25b   : > { %s957_s25 = spop %956  ;;  %s565_s6 = scvt.s32.f32 %s955_s4 }
 0x25c   : > { %s959_s27 = spop %958  ;;  %s597_s20 = scvt.s32.f32 %s957_s25 }
 0x25d   : > { %s620_s7 = sadd.f32 %s959_s27, %s945_s30  ;;  %s507_s30 = smul.f32 3.0, %s1581_s29 }
 0x25e   : > { %s969_s12 = spop %968  ;;  %s907_s4 = sshll.u32 %s1628_s13, 3 }
 0x25f   : > { %s657_s21 = scvt.s32.f32 %s969_s12  ;;  %s971_s28 = spop %970  ;;  %v809_v43 = vstv %s507_s30 }
 0x260   : > { %s689_s8 = scvt.s32.f32 %s971_s28  ;;  %v810_v9 = vmul.f32 %v928_v53, %v809_v43  ;;  %s201_s27 = scalar_lea.vmem %s1612_s2, %s907_s4 }
 0x261   : > { %s658_s9 = sadd.f32 %s657_s21, %s565_s6 }
 0x262   : > { %s690_s19 = sadd.f32 %s689_s8, %s597_s20 }
 0x266   : > { %s973_s15 = spop %972 }
 0x267   : > { %s712_s24 = sadd.f32 %s973_s15, %s620_s7  ;;  %s983_s26 = spop %982 }
 0x268   : > { %s749_s3 = scvt.s32.f32 %s983_s26  ;;  %s985_s22 = spop %984 }
 0x269   : > { %s781_s18 = scvt.s32.f32 %s985_s22  ;;  %v786_v45 = vstv %s712_s24 }
 0x26a   : > { %s750_s16 = sadd.f32 %s749_s3, %s658_s9  ;;  %v787_v40 = vmul.f32 %v924_v14, %v786_v45 }
 0x26b   : > { %s782_s23 = sadd.f32 %s781_s18, %s690_s19 }
 0x26c   : > { %v791_v5 = vstv %s750_s16 }
 0x26d   : > { %v792_v47 = vmul.f32 %v925_v55, %v791_v5  ;;  %v803_v51 = vstv %s782_s23 }
 0x26e   : > { %v804_v23 = vmul.f32 %v927_v50, %v803_v51 }
 0x26f   : > { %v793_v11 = vadd.f32 %v792_v47, %v787_v40 }
 0x271   : > { %v799_v3 = vadd.f32 %v798_v52, %v793_v11 }
 0x273   : > { %v805_v30 = vadd.f32 %v804_v23, %v799_v3 }
 0x275   : > { %v811_v62 = vadd.f32 %v810_v9, %v805_v30 }
 0x277   : > { %812 = vst [vmem:[%s201_s27] sm:$0xff] %v811_v62 }
 0x278 PF: > { %p15_p11 = scmp.ge.s32.totalorder %s1190_s14, 4   ;;  %s1623_s9 = smov %s1136_s10 }
 0x279   : > { %s1624_s10 = smov %s1140_s11  ;;  %s1625_s11 = smov %s1200_s17 }
 0x27a   : > { %s1626_s12 = smov %s1190_s14  ;;  %17 = sbr.rel (!%p15_p11) target bundleno = 5 (0x5), region = 85 }
 0x281   :  { %832 = vsyncpa [#allocation4], 1 }
 0x282   :  { %834 = vsyncpa [#allocation4 + $0x1], 1 }
 0x283   :  { %835 = vsyncpa [#allocation6], 1 }
 0x284   :  { %837 = vsyncpa [#allocation6 + $0x1], 1 }

</bundles_post_ra>
